<compile_context>
chip_gen: v5e
topology: v5e:2x2
jax: 0.10.0
libtpu: 0.0.40
codegen_flags: <defaults>
</compile_context>

<pallas_src>
import functools

import jax
import jax.numpy as jnp
from jax.experimental import pallas as pl
from jax.experimental.pallas import tpu as pltpu


def mha_kernel(x_ref, wqkv_ref, bqkv_ref, wo_ref, bo_ref, out_ref, *,
               batch_tile: int, seq: int, hidden: int, num_heads: int):
    Bt, S, H = batch_tile, seq, hidden
    hs = H // num_heads
    rows = Bt * S

    # ---- fused QKV projection: all Bt*S rows in one MXU matmul (lane-dense 3H) ----
    x2d = x_ref[...].reshape(rows, H)            # collapse (Bt, S) -> rows; lane dim unchanged
    qkv = jnp.dot(x2d, wqkv_ref[...],
                  preferred_element_type=jnp.float32) + bqkv_ref[...]   # (rows, 3H)

    # ---- causal "mask": reference adds +1e4 where col <= row, before softmax ----
    r = jax.lax.broadcasted_iota(jnp.int32, (S, S), 0)
    c = jax.lax.broadcasted_iota(jnp.int32, (S, S), 1)
    causal = c <= r                              # bool, built once per grid step

    scale = jnp.float32(1.0 / (hidden ** 0.5))   # scaled by full emb, as in the reference
    wo = wo_ref[...]                             # (H, H), loaded once

    acc = jnp.zeros((Bt, S, H), jnp.float32)
    # Static unroll over heads (nh=4). With headsize=12 the per-head column slices
    # are sub-vreg lane extracts; if num_heads/seq grow, switch to a head-batched
    # dot_general with heads on a leading batch axis.
    for h in range(num_heads):
        lo = h * hs
        q_h = qkv[:, lo:lo + hs].reshape(Bt, S, hs)
        k_h = qkv[:, H + lo:H + lo + hs].reshape(Bt, S, hs)
        v_h = qkv[:, 2 * H + lo:2 * H + lo + hs].reshape(Bt, S, hs)

        # scores for all Bt batches of this head at once
        s = jnp.einsum('bqh,bkh->bqk', q_h * scale, k_h,
                       preferred_element_type=jnp.float32)        # (Bt, S, S)
        s = jnp.where(causal, s + jnp.float32(1e4), s)            # fused mask apply

        m = jnp.max(s, axis=-1, keepdims=True)
        e = jnp.exp(s - m)
        denom = jnp.sum(e, axis=-1, keepdims=True)
        # per-row reciprocal + multiply (far fewer divides than e / denom broadcast)
        p = e * pl.reciprocal(denom, approx=False)

        # Fold W_O into the head path: (v_h @ W_O[head rows]) keeps every result
        # lane-dense at width H and removes the head concatenate (XLU relayout).
        vo_h = jnp.einsum('bkh,hd->bkd', v_h, wo[lo:lo + hs, :],
                          preferred_element_type=jnp.float32)     # (Bt, S, H)
        acc = acc + jnp.einsum('bqk,bkd->bqd', p, vo_h,
                               preferred_element_type=jnp.float32)

    out_ref[...] = (acc + bo_ref[...]).astype(out_ref.dtype)


def _pick_batch_tile(B, S, row_target=256):
    """Largest divisor of B packing <= row_target rows per step, but keep >= 2
    parallel grid steps when B allows it (v7x has 2 TensorCores)."""
    bt = 1
    for cand in range(1, B + 1):
        if B % cand == 0 and cand * S <= row_target:
            bt = cand
    if B >= 2 and B // bt < 2:
        for cand in range(bt, 0, -1):
            if B % cand == 0 and B // cand >= 2:
                bt = cand
                break
    return bt


def multihead_masked_attention_forward(x, wqkv, bqkv, wo, bo, num_heads):
    B, S, H = x.shape
    Bt = _pick_batch_tile(B, S)
    hs = H // num_heads

    flops = (2 * B * S * H * 3 * H                       # QKV projection
             + num_heads * (2 * B * S * S * hs           # Q @ K^T
                            + 2 * B * S * hs * H         # V_h @ W_O rows
                            + 2 * B * S * S * H))        # P @ (V_h W_O)
    bytes_accessed = 4 * (x.size + wqkv.size + bqkv.size + wo.size + bo.size + B * S * H)
    cost = pl.CostEstimate(flops=flops,
                           transcendentals=B * num_heads * S * S,
                           bytes_accessed=bytes_accessed)

    kernel = functools.partial(mha_kernel, batch_tile=Bt, seq=S, hidden=H,
                               num_heads=num_heads)
    return pl.pallas_call(
        kernel,
        out_shape=jax.ShapeDtypeStruct((B, S, H), x.dtype),
        grid=(B // Bt,),
        in_specs=[
            pl.BlockSpec((Bt, S, H), lambda b: (b, 0, 0)),   # x: Bt batches per step
            # Weights use a constant index_map (stay resident in VMEM). For large H
            # on v7x (64 MiB VMEM), single-buffer them via pipeline_mode=pl.Buffered(1).
            pl.BlockSpec((H, 3 * H), lambda b: (0, 0)),      # W_QKV (in, out)
            pl.BlockSpec((1, 3 * H), lambda b: (0, 0)),      # b_QKV
            pl.BlockSpec((H, H), lambda b: (0, 0)),          # W_O (in, out)
            pl.BlockSpec((1, H), lambda b: (0, 0)),          # b_O
        ],
        out_specs=pl.BlockSpec((Bt, S, H), lambda b: (b, 0, 0)),
        compiler_params=pltpu.CompilerParams(dimension_semantics=("parallel",)),
        cost_estimate=cost,
    )(x, wqkv, bqkv, wo, bo)


def ref_forward(x, wqkv, bqkv, wo, bo, num_heads):
    """Plain-JAX reference replicating the PyTorch code exactly."""
    B, S, H = x.shape
    hs = H // num_heads
    qkv = x @ wqkv + bqkv[0]
    q, k, v = qkv[..., :H], qkv[..., H:2 * H], qkv[..., 2 * H:]

    def heads(t):
        return t.reshape(B, S, num_heads, hs).transpose(0, 2, 1, 3)

    q_, k_, v_ = heads(q), heads(k), heads(v)
    scores = jnp.einsum('bnqh,bnkh->bnqk', q_, k_) / (H ** 0.5)
    tri = jnp.tril(jnp.ones((S, S), dtype=jnp.float32)) * (-1e4)
    scores = scores - tri
    probs = jax.nn.softmax(scores, axis=-1)
    av = jnp.einsum('bnqk,bnkh->bnqh', probs, v_).transpose(0, 2, 1, 3).reshape(B, S, H)
    return av @ wo + bo[0]


if __name__ == "__main__":
    B, S, H, NH = 4, 16, 48, 4  # hidden_size == emb == 48, num_heads == 4

    key = jax.random.PRNGKey(0)
    k_x, k_wq, k_bq, k_wo, k_bo = jax.random.split(key, 5)

    x = jax.random.uniform(k_x, (B, S, H), dtype=jnp.float32)

    # nn.Linear-style deterministic init: U(-1/sqrt(fan_in), 1/sqrt(fan_in))
    bound = 1.0 / (H ** 0.5)
    wqkv = jax.random.uniform(k_wq, (H, 3 * H), minval=-bound, maxval=bound, dtype=jnp.float32)
    bqkv = jax.random.uniform(k_bq, (1, 3 * H), minval=-bound, maxval=bound, dtype=jnp.float32)
    wo = jax.random.uniform(k_wo, (H, H), minval=-bound, maxval=bound, dtype=jnp.float32)
    bo = jax.random.uniform(k_bo, (1, H), minval=-bound, maxval=bound, dtype=jnp.float32)

    out = multihead_masked_attention_forward(x, wqkv, bqkv, wo, bo, NH)
    out = jax.block_until_ready(out)

    ref = ref_forward(x, wqkv, bqkv, wo, bo, NH)
    assert out.shape == (B, S, H), out.shape
    max_err = float(jnp.max(jnp.abs(out - ref)))
    assert jnp.allclose(out, ref, atol=1e-4, rtol=1e-4), f"max abs err {max_err}"

    print("KERNEL_OK")
</pallas_src>

<mosaic_0001>
module attributes {stable_mosaic.version = 11 : i64} {
  func.func @mha_kernel(%arg0: i32, %arg1: memref<2x16x48xf32, #tpu.memory_space<vmem>>, %arg2: memref<48x144xf32, #tpu.memory_space<vmem>>, %arg3: memref<1x144xf32, #tpu.memory_space<vmem>>, %arg4: memref<48x48xf32, #tpu.memory_space<vmem>>, %arg5: memref<1x48xf32, #tpu.memory_space<vmem>>, %arg6: memref<2x16x48xf32, #tpu.memory_space<vmem>>) attributes {dimension_semantics = [#tpu.dimension_semantics<parallel>], iteration_bounds = array<i64: 2>, scalar_prefetch = 0 : i64, scratch_operands = 0 : i64, tpu.core_type = #tpu.core_type<tc>, window_params = [{transform_indices = @transform_0, window_bounds = array<i64: 2, 16, 48>}, {pipeline_mode = #tpu.pipeline_mode<synchronous>, transform_indices = @transform_1, window_bounds = array<i64: 48, 144>}, {pipeline_mode = #tpu.pipeline_mode<synchronous>, transform_indices = @transform_2, window_bounds = array<i64: 1, 144>}, {pipeline_mode = #tpu.pipeline_mode<synchronous>, transform_indices = @transform_3, window_bounds = array<i64: 48, 48>}, {pipeline_mode = #tpu.pipeline_mode<synchronous>, transform_indices = @transform_4, window_bounds = array<i64: 1, 48>}, {transform_indices = @transform_5, window_bounds = array<i64: 2, 16, 48>}]} {
    %c0 = arith.constant 0 : index
    %c0_0 = arith.constant 0 : index
    %c0_1 = arith.constant 0 : index
    %0 = vector.load %arg1[%c0, %c0_0, %c0_1] : memref<2x16x48xf32, #tpu.memory_space<vmem>>, vector<2x16x48xf32>
    %1 = vector.shape_cast %0 : vector<2x16x48xf32> to vector<32x48xf32>
    %c0_2 = arith.constant 0 : index
    %c0_3 = arith.constant 0 : index
    %2 = vector.load %arg2[%c0_2, %c0_3] : memref<48x144xf32, #tpu.memory_space<vmem>>, vector<48x144xf32>
    %cst = arith.constant dense<0.000000e+00> : vector<32x144xf32>
    %3 = tpu.matmul %1, %2, %cst {dimension_numbers = #tpu.dot_dimension_numbers<[1], [0], [0], [1], [0, 0, 1, 1], [], []>} : vector<32x48xf32>, vector<48x144xf32>, vector<32x144xf32> -> vector<32x144xf32>
    %c0_4 = arith.constant 0 : index
    %c0_5 = arith.constant 0 : index
    %4 = vector.load %arg3[%c0_4, %c0_5] : memref<1x144xf32, #tpu.memory_space<vmem>>, vector<1x144xf32>
    %5 = vector.broadcast %4 : vector<1x144xf32> to vector<32x144xf32>
    %6 = arith.addf %3, %5 : vector<32x144xf32>
    %7 = tpu.iota {dimensions = array<i32: 0>} : vector<16x16xi32>
    %8 = tpu.iota {dimensions = array<i32: 1>} : vector<16x16xi32>
    %9 = arith.cmpi sle, %8, %7 : vector<16x16xi32>
    %c0_6 = arith.constant 0 : index
    %c0_7 = arith.constant 0 : index
    %10 = vector.load %arg4[%c0_6, %c0_7] : memref<48x48xf32, #tpu.memory_space<vmem>>, vector<48x48xf32>
    %cst_8 = arith.constant 0.000000e+00 : f32
    %11 = vector.broadcast %cst_8 : f32 to vector<2x16x48xf32>
    %12 = vector.extract_strided_slice %6 {offsets = [0, 0], sizes = [32, 12], strides = [1, 1]} : vector<32x144xf32> to vector<32x12xf32>
    %13 = vector.shape_cast %12 : vector<32x12xf32> to vector<2x16x12xf32>
    %14 = vector.extract_strided_slice %6 {offsets = [0, 48], sizes = [32, 12], strides = [1, 1]} : vector<32x144xf32> to vector<32x12xf32>
    %15 = vector.shape_cast %14 : vector<32x12xf32> to vector<2x16x12xf32>
    %16 = vector.extract_strided_slice %6 {offsets = [0, 96], sizes = [32, 12], strides = [1, 1]} : vector<32x144xf32> to vector<32x12xf32>
    %17 = vector.shape_cast %16 : vector<32x12xf32> to vector<2x16x12xf32>
    %cst_9 = arith.constant 0.144337565 : f32
    %18 = vector.broadcast %cst_9 : f32 to vector<2x16x12xf32>
    %19 = arith.mulf %13, %18 : vector<2x16x12xf32>
    "tpu.trace_start"() <{level = 10 : i32, message = "bqh,bkh->bqk"}> : () -> ()
    %cst_10 = arith.constant dense<0.000000e+00> : vector<2x16x16xf32>
    %20 = tpu.matmul %19, %15, %cst_10 {dimension_numbers = #tpu.dot_dimension_numbers<[2], [2], [1], [1], [0, 0, 0, 1, 1, 1], [0], [0]>} : vector<2x16x12xf32>, vector<2x16x12xf32>, vector<2x16x16xf32> -> vector<2x16x16xf32>
    "tpu.trace_stop"() : () -> ()
    %cst_11 = arith.constant 1.000000e+04 : f32
    %21 = vector.broadcast %cst_11 : f32 to vector<2x16x16xf32>
    %22 = arith.addf %20, %21 : vector<2x16x16xf32>
    %23 = vector.shape_cast %9 : vector<16x16xi1> to vector<1x16x16xi1>
    %24 = vector.broadcast %23 : vector<1x16x16xi1> to vector<2x16x16xi1>
    %25 = arith.select %24, %22, %20 : vector<2x16x16xi1>, vector<2x16x16xf32>
    %cst_12 = arith.constant dense<0xFF800000> : vector<2x16xf32>
    %26 = vector.multi_reduction <maximumf>, %25, %cst_12 [2] : vector<2x16x16xf32> to vector<2x16xf32>
    %27 = vector.shape_cast %26 : vector<2x16xf32> to vector<2x16x1xf32>
    %28 = vector.broadcast %27 : vector<2x16x1xf32> to vector<2x16x16xf32>
    %29 = arith.subf %25, %28 : vector<2x16x16xf32>
    %30 = math.exp %29 : vector<2x16x16xf32>
    %cst_13 = arith.constant dense<0.000000e+00> : vector<2x16xf32>
    %31 = vector.multi_reduction <add>, %30, %cst_13 [2] : vector<2x16x16xf32> to vector<2x16xf32>
    %32 = vector.shape_cast %31 : vector<2x16xf32> to vector<2x16x1xf32>
    %33 = tpu.reciprocal %32 : vector<2x16x1xf32> -> vector<2x16x1xf32>
    %34 = vector.broadcast %33 : vector<2x16x1xf32> to vector<2x16x16xf32>
    %35 = arith.mulf %30, %34 : vector<2x16x16xf32>
    %36 = vector.extract_strided_slice %10 {offsets = [0, 0], sizes = [12, 48], strides = [1, 1]} : vector<48x48xf32> to vector<12x48xf32>
    "tpu.trace_start"() <{level = 10 : i32, message = "bkh,hd->bkd"}> : () -> ()
    %cst_14 = arith.constant dense<0.000000e+00> : vector<2x16x48xf32>
    %37 = tpu.matmul %17, %36, %cst_14 {dimension_numbers = #tpu.dot_dimension_numbers<[2], [0], [0, 1], [1], [0, 0, 0, 1, 1, 1], [], []>} : vector<2x16x12xf32>, vector<12x48xf32>, vector<2x16x48xf32> -> vector<2x16x48xf32>
    "tpu.trace_stop"() : () -> ()
    "tpu.trace_start"() <{level = 10 : i32, message = "bqk,bkd->bqd"}> : () -> ()
    %cst_15 = arith.constant dense<0.000000e+00> : vector<2x16x48xf32>
    %38 = tpu.matmul %35, %37, %cst_15 {dimension_numbers = #tpu.dot_dimension_numbers<[2], [1], [1], [2], [0, 0, 0, 1, 1, 2], [0], [0]>} : vector<2x16x16xf32>, vector<2x16x48xf32>, vector<2x16x48xf32> -> vector<2x16x48xf32>
    "tpu.trace_stop"() : () -> ()
    %39 = arith.addf %11, %38 : vector<2x16x48xf32>
    %40 = vector.extract_strided_slice %6 {offsets = [0, 12], sizes = [32, 12], strides = [1, 1]} : vector<32x144xf32> to vector<32x12xf32>
    %41 = vector.shape_cast %40 : vector<32x12xf32> to vector<2x16x12xf32>
    %42 = vector.extract_strided_slice %6 {offsets = [0, 60], sizes = [32, 12], strides = [1, 1]} : vector<32x144xf32> to vector<32x12xf32>
    %43 = vector.shape_cast %42 : vector<32x12xf32> to vector<2x16x12xf32>
    %44 = vector.extract_strided_slice %6 {offsets = [0, 108], sizes = [32, 12], strides = [1, 1]} : vector<32x144xf32> to vector<32x12xf32>
    %45 = vector.shape_cast %44 : vector<32x12xf32> to vector<2x16x12xf32>
    %cst_16 = arith.constant 0.144337565 : f32
    %46 = vector.broadcast %cst_16 : f32 to vector<2x16x12xf32>
    %47 = arith.mulf %41, %46 : vector<2x16x12xf32>
    "tpu.trace_start"() <{level = 10 : i32, message = "bqh,bkh->bqk"}> : () -> ()
    %cst_17 = arith.constant dense<0.000000e+00> : vector<2x16x16xf32>
    %48 = tpu.matmul %47, %43, %cst_17 {dimension_numbers = #tpu.dot_dimension_numbers<[2], [2], [1], [1], [0, 0, 0, 1, 1, 1], [0], [0]>} : vector<2x16x12xf32>, vector<2x16x12xf32>, vector<2x16x16xf32> -> vector<2x16x16xf32>
    "tpu.trace_stop"() : () -> ()
    %cst_18 = arith.constant 1.000000e+04 : f32
    %49 = vector.broadcast %cst_18 : f32 to vector<2x16x16xf32>
    %50 = arith.addf %48, %49 : vector<2x16x16xf32>
    %51 = vector.shape_cast %9 : vector<16x16xi1> to vector<1x16x16xi1>
    %52 = vector.broadcast %51 : vector<1x16x16xi1> to vector<2x16x16xi1>
    %53 = arith.select %52, %50, %48 : vector<2x16x16xi1>, vector<2x16x16xf32>
    %cst_19 = arith.constant dense<0xFF800000> : vector<2x16xf32>
    %54 = vector.multi_reduction <maximumf>, %53, %cst_19 [2] : vector<2x16x16xf32> to vector<2x16xf32>
    %55 = vector.shape_cast %54 : vector<2x16xf32> to vector<2x16x1xf32>
    %56 = vector.broadcast %55 : vector<2x16x1xf32> to vector<2x16x16xf32>
    %57 = arith.subf %53, %56 : vector<2x16x16xf32>
    %58 = math.exp %57 : vector<2x16x16xf32>
    %cst_20 = arith.constant dense<0.000000e+00> : vector<2x16xf32>
    %59 = vector.multi_reduction <add>, %58, %cst_20 [2] : vector<2x16x16xf32> to vector<2x16xf32>
    %60 = vector.shape_cast %59 : vector<2x16xf32> to vector<2x16x1xf32>
    %61 = tpu.reciprocal %60 : vector<2x16x1xf32> -> vector<2x16x1xf32>
    %62 = vector.broadcast %61 : vector<2x16x1xf32> to vector<2x16x16xf32>
    %63 = arith.mulf %58, %62 : vector<2x16x16xf32>
    %64 = vector.extract_strided_slice %10 {offsets = [12, 0], sizes = [12, 48], strides = [1, 1]} : vector<48x48xf32> to vector<12x48xf32>
    "tpu.trace_start"() <{level = 10 : i32, message = "bkh,hd->bkd"}> : () -> ()
    %cst_21 = arith.constant dense<0.000000e+00> : vector<2x16x48xf32>
    %65 = tpu.matmul %45, %64, %cst_21 {dimension_numbers = #tpu.dot_dimension_numbers<[2], [0], [0, 1], [1], [0, 0, 0, 1, 1, 1], [], []>} : vector<2x16x12xf32>, vector<12x48xf32>, vector<2x16x48xf32> -> vector<2x16x48xf32>
    "tpu.trace_stop"() : () -> ()
    "tpu.trace_start"() <{level = 10 : i32, message = "bqk,bkd->bqd"}> : () -> ()
    %cst_22 = arith.constant dense<0.000000e+00> : vector<2x16x48xf32>
    %66 = tpu.matmul %63, %65, %cst_22 {dimension_numbers = #tpu.dot_dimension_numbers<[2], [1], [1], [2], [0, 0, 0, 1, 1, 2], [0], [0]>} : vector<2x16x16xf32>, vector<2x16x48xf32>, vector<2x16x48xf32> -> vector<2x16x48xf32>
    "tpu.trace_stop"() : () -> ()
    %67 = arith.addf %39, %66 : vector<2x16x48xf32>
    %68 = vector.extract_strided_slice %6 {offsets = [0, 24], sizes = [32, 12], strides = [1, 1]} : vector<32x144xf32> to vector<32x12xf32>
    %69 = vector.shape_cast %68 : vector<32x12xf32> to vector<2x16x12xf32>
    %70 = vector.extract_strided_slice %6 {offsets = [0, 72], sizes = [32, 12], strides = [1, 1]} : vector<32x144xf32> to vector<32x12xf32>
    %71 = vector.shape_cast %70 : vector<32x12xf32> to vector<2x16x12xf32>
    %72 = vector.extract_strided_slice %6 {offsets = [0, 120], sizes = [32, 12], strides = [1, 1]} : vector<32x144xf32> to vector<32x12xf32>
    %73 = vector.shape_cast %72 : vector<32x12xf32> to vector<2x16x12xf32>
    %cst_23 = arith.constant 0.144337565 : f32
    %74 = vector.broadcast %cst_23 : f32 to vector<2x16x12xf32>
    %75 = arith.mulf %69, %74 : vector<2x16x12xf32>
    "tpu.trace_start"() <{level = 10 : i32, message = "bqh,bkh->bqk"}> : () -> ()
    %cst_24 = arith.constant dense<0.000000e+00> : vector<2x16x16xf32>
    %76 = tpu.matmul %75, %71, %cst_24 {dimension_numbers = #tpu.dot_dimension_numbers<[2], [2], [1], [1], [0, 0, 0, 1, 1, 1], [0], [0]>} : vector<2x16x12xf32>, vector<2x16x12xf32>, vector<2x16x16xf32> -> vector<2x16x16xf32>
    "tpu.trace_stop"() : () -> ()
    %cst_25 = arith.constant 1.000000e+04 : f32
    %77 = vector.broadcast %cst_25 : f32 to vector<2x16x16xf32>
    %78 = arith.addf %76, %77 : vector<2x16x16xf32>
    %79 = vector.shape_cast %9 : vector<16x16xi1> to vector<1x16x16xi1>
    %80 = vector.broadcast %79 : vector<1x16x16xi1> to vector<2x16x16xi1>
    %81 = arith.select %80, %78, %76 : vector<2x16x16xi1>, vector<2x16x16xf32>
    %cst_26 = arith.constant dense<0xFF800000> : vector<2x16xf32>
    %82 = vector.multi_reduction <maximumf>, %81, %cst_26 [2] : vector<2x16x16xf32> to vector<2x16xf32>
    %83 = vector.shape_cast %82 : vector<2x16xf32> to vector<2x16x1xf32>
    %84 = vector.broadcast %83 : vector<2x16x1xf32> to vector<2x16x16xf32>
    %85 = arith.subf %81, %84 : vector<2x16x16xf32>
    %86 = math.exp %85 : vector<2x16x16xf32>
    %cst_27 = arith.constant dense<0.000000e+00> : vector<2x16xf32>
    %87 = vector.multi_reduction <add>, %86, %cst_27 [2] : vector<2x16x16xf32> to vector<2x16xf32>
    %88 = vector.shape_cast %87 : vector<2x16xf32> to vector<2x16x1xf32>
    %89 = tpu.reciprocal %88 : vector<2x16x1xf32> -> vector<2x16x1xf32>
    %90 = vector.broadcast %89 : vector<2x16x1xf32> to vector<2x16x16xf32>
    %91 = arith.mulf %86, %90 : vector<2x16x16xf32>
    %92 = vector.extract_strided_slice %10 {offsets = [24, 0], sizes = [12, 48], strides = [1, 1]} : vector<48x48xf32> to vector<12x48xf32>
    "tpu.trace_start"() <{level = 10 : i32, message = "bkh,hd->bkd"}> : () -> ()
    %cst_28 = arith.constant dense<0.000000e+00> : vector<2x16x48xf32>
    %93 = tpu.matmul %73, %92, %cst_28 {dimension_numbers = #tpu.dot_dimension_numbers<[2], [0], [0, 1], [1], [0, 0, 0, 1, 1, 1], [], []>} : vector<2x16x12xf32>, vector<12x48xf32>, vector<2x16x48xf32> -> vector<2x16x48xf32>
    "tpu.trace_stop"() : () -> ()
    "tpu.trace_start"() <{level = 10 : i32, message = "bqk,bkd->bqd"}> : () -> ()
    %cst_29 = arith.constant dense<0.000000e+00> : vector<2x16x48xf32>
    %94 = tpu.matmul %91, %93, %cst_29 {dimension_numbers = #tpu.dot_dimension_numbers<[2], [1], [1], [2], [0, 0, 0, 1, 1, 2], [0], [0]>} : vector<2x16x16xf32>, vector<2x16x48xf32>, vector<2x16x48xf32> -> vector<2x16x48xf32>
    "tpu.trace_stop"() : () -> ()
    %95 = arith.addf %67, %94 : vector<2x16x48xf32>
    %96 = vector.extract_strided_slice %6 {offsets = [0, 36], sizes = [32, 12], strides = [1, 1]} : vector<32x144xf32> to vector<32x12xf32>
    %97 = vector.shape_cast %96 : vector<32x12xf32> to vector<2x16x12xf32>
    %98 = vector.extract_strided_slice %6 {offsets = [0, 84], sizes = [32, 12], strides = [1, 1]} : vector<32x144xf32> to vector<32x12xf32>
    %99 = vector.shape_cast %98 : vector<32x12xf32> to vector<2x16x12xf32>
    %100 = vector.extract_strided_slice %6 {offsets = [0, 132], sizes = [32, 12], strides = [1, 1]} : vector<32x144xf32> to vector<32x12xf32>
    %101 = vector.shape_cast %100 : vector<32x12xf32> to vector<2x16x12xf32>
    %cst_30 = arith.constant 0.144337565 : f32
    %102 = vector.broadcast %cst_30 : f32 to vector<2x16x12xf32>
    %103 = arith.mulf %97, %102 : vector<2x16x12xf32>
    "tpu.trace_start"() <{level = 10 : i32, message = "bqh,bkh->bqk"}> : () -> ()
    %cst_31 = arith.constant dense<0.000000e+00> : vector<2x16x16xf32>
    %104 = tpu.matmul %103, %99, %cst_31 {dimension_numbers = #tpu.dot_dimension_numbers<[2], [2], [1], [1], [0, 0, 0, 1, 1, 1], [0], [0]>} : vector<2x16x12xf32>, vector<2x16x12xf32>, vector<2x16x16xf32> -> vector<2x16x16xf32>
    "tpu.trace_stop"() : () -> ()
    %cst_32 = arith.constant 1.000000e+04 : f32
    %105 = vector.broadcast %cst_32 : f32 to vector<2x16x16xf32>
    %106 = arith.addf %104, %105 : vector<2x16x16xf32>
    %107 = vector.shape_cast %9 : vector<16x16xi1> to vector<1x16x16xi1>
    %108 = vector.broadcast %107 : vector<1x16x16xi1> to vector<2x16x16xi1>
    %109 = arith.select %108, %106, %104 : vector<2x16x16xi1>, vector<2x16x16xf32>
    %cst_33 = arith.constant dense<0xFF800000> : vector<2x16xf32>
    %110 = vector.multi_reduction <maximumf>, %109, %cst_33 [2] : vector<2x16x16xf32> to vector<2x16xf32>
    %111 = vector.shape_cast %110 : vector<2x16xf32> to vector<2x16x1xf32>
    %112 = vector.broadcast %111 : vector<2x16x1xf32> to vector<2x16x16xf32>
    %113 = arith.subf %109, %112 : vector<2x16x16xf32>
    %114 = math.exp %113 : vector<2x16x16xf32>
    %cst_34 = arith.constant dense<0.000000e+00> : vector<2x16xf32>
    %115 = vector.multi_reduction <add>, %114, %cst_34 [2] : vector<2x16x16xf32> to vector<2x16xf32>
    %116 = vector.shape_cast %115 : vector<2x16xf32> to vector<2x16x1xf32>
    %117 = tpu.reciprocal %116 : vector<2x16x1xf32> -> vector<2x16x1xf32>
    %118 = vector.broadcast %117 : vector<2x16x1xf32> to vector<2x16x16xf32>
    %119 = arith.mulf %114, %118 : vector<2x16x16xf32>
    %120 = vector.extract_strided_slice %10 {offsets = [36, 0], sizes = [12, 48], strides = [1, 1]} : vector<48x48xf32> to vector<12x48xf32>
    "tpu.trace_start"() <{level = 10 : i32, message = "bkh,hd->bkd"}> : () -> ()
    %cst_35 = arith.constant dense<0.000000e+00> : vector<2x16x48xf32>
    %121 = tpu.matmul %101, %120, %cst_35 {dimension_numbers = #tpu.dot_dimension_numbers<[2], [0], [0, 1], [1], [0, 0, 0, 1, 1, 1], [], []>} : vector<2x16x12xf32>, vector<12x48xf32>, vector<2x16x48xf32> -> vector<2x16x48xf32>
    "tpu.trace_stop"() : () -> ()
    "tpu.trace_start"() <{level = 10 : i32, message = "bqk,bkd->bqd"}> : () -> ()
    %cst_36 = arith.constant dense<0.000000e+00> : vector<2x16x48xf32>
    %122 = tpu.matmul %119, %121, %cst_36 {dimension_numbers = #tpu.dot_dimension_numbers<[2], [1], [1], [2], [0, 0, 0, 1, 1, 2], [0], [0]>} : vector<2x16x16xf32>, vector<2x16x48xf32>, vector<2x16x48xf32> -> vector<2x16x48xf32>
    "tpu.trace_stop"() : () -> ()
    %123 = arith.addf %95, %122 : vector<2x16x48xf32>
    %c0_37 = arith.constant 0 : index
    %c0_38 = arith.constant 0 : index
    %124 = vector.load %arg5[%c0_37, %c0_38] : memref<1x48xf32, #tpu.memory_space<vmem>>, vector<1x48xf32>
    %125 = vector.shape_cast %124 : vector<1x48xf32> to vector<1x1x48xf32>
    %126 = vector.broadcast %125 : vector<1x1x48xf32> to vector<2x16x48xf32>
    %127 = arith.addf %123, %126 : vector<2x16x48xf32>
    %c0_39 = arith.constant 0 : index
    %c0_40 = arith.constant 0 : index
    %c0_41 = arith.constant 0 : index
    %128 = vector.load %arg6[%c0_39, %c0_40, %c0_41] : memref<2x16x48xf32, #tpu.memory_space<vmem>>, vector<2x16x48xf32>
    tpu.vector_store %arg6[%c0_39, %c0_40, %c0_41], %127 {strides = array<i32>} : memref<2x16x48xf32, #tpu.memory_space<vmem>>, vector<2x16x48xf32>,
    return
  }
  func.func @transform_0(%arg0: i32) -> (i32, i32, i32) {
    %c0_i32 = arith.constant 0 : i32
    %c0_i32_0 = arith.constant 0 : i32
    %c0_i32_1 = arith.constant 0 : i32
    return %arg0, %c0_i32, %c0_i32_0 : i32, i32, i32
  }
  func.func @transform_1(%arg0: i32) -> (i32, i32) {
    %c0_i32 = arith.constant 0 : i32
    %c0_i32_0 = arith.constant 0 : i32
    %c0_i32_1 = arith.constant 0 : i32
    return %c0_i32, %c0_i32_0 : i32, i32
  }
  func.func @transform_2(%arg0: i32) -> (i32, i32) {
    %c0_i32 = arith.constant 0 : i32
    %c0_i32_0 = arith.constant 0 : i32
    %c0_i32_1 = arith.constant 0 : i32
    return %c0_i32, %c0_i32_0 : i32, i32
  }
  func.func @transform_3(%arg0: i32) -> (i32, i32) {
    %c0_i32 = arith.constant 0 : i32
    %c0_i32_0 = arith.constant 0 : i32
    %c0_i32_1 = arith.constant 0 : i32
    return %c0_i32, %c0_i32_0 : i32, i32
  }
  func.func @transform_4(%arg0: i32) -> (i32, i32) {
    %c0_i32 = arith.constant 0 : i32
    %c0_i32_0 = arith.constant 0 : i32
    %c0_i32_1 = arith.constant 0 : i32
    return %c0_i32, %c0_i32_0 : i32, i32
  }
  func.func @transform_5(%arg0: i32) -> (i32, i32, i32) {
    %c0_i32 = arith.constant 0 : i32
    %c0_i32_0 = arith.constant 0 : i32
    %c0_i32_1 = arith.constant 0 : i32
    return %arg0, %c0_i32, %c0_i32_0 : i32, i32, i32
  }
}

</mosaic_0001>

<bundles_post_ra>
// kernel: tpu_custom_call.1
= control target key start
LH: loop header
LB: loop body
LE: loop exit
PB: predicated region body
PF: predicated region fallthrough
CT: control target
= control target key end

     0   :  { %10 = vsyncpa [#allocation3], 0  ;;  %s2845_s0 = inlined_call_operand.hbm [shape: f32[4,16,48], index: 0, kind: input, shape index: {}]   ;;  %s2846_s1 = inlined_call_operand.hbm [shape: f32[48,144], index: 1, kind: input, shape index: {}]   ;;  %s2847_s2 = inlined_call_operand.hbm [shape: f32[1,144], index: 2, kind: input, shape index: {}]   ;;  %s2848_s3 = inlined_call_operand.hbm [shape: f32[48,48], index: 3, kind: input, shape index: {}]   ;;  %s2849_s4 = inlined_call_operand.vmem [shape: f32[1,48], index: 4, kind: input, shape index: {}]   ;;  %s2850_s5 = inlined_call_operand.hbm [shape: f32[4,16,48], index: 5, kind: output, shape index: {}]  }
   0x1   :  { %12 = vsyncpa [#allocation3 + $0x1], 0 }
   0x2   :  { %13 = vsyncpa [#allocation6], 0 }
   0x3   :  { %14 = vsyncpa [#allocation9], 0 }
   0x4   :  { %15 = vsyncpa [#allocation4], 0 }
   0x5   :  { %17 = vsyncpa [#allocation4 + $0x1], 0  ;;  %s2234_s18 = smov 0   ;;  %s2236_s19 = smov 0  }
   0x6   :  { %s2238_s20 = smov 0   ;;  %s2240_s21 = smov 0  }
   0x7 LB: > { %s2255_s22 = sadd.s32 4294967295, %s2183_s21   ;;  %s1729_s23 = sadd.s32 4294967294, %s2183_s21   ;;  %s2183_s21 = sphi %s2240_s21, %s2867_s21   ;;  %s2179_s20 = sphi %s2238_s20, %s2866_s20   ;;  %s2175_s19 = sphi %s2236_s19, %s2865_s19   ;;  %s2171_s18 = sphi %s2234_s18, %s2864_s18  }
   0x8   : > { %p43_p0 = scmp.ne.s32.totalorder %s2175_s19, %s2171_s18  ;;  %p44_p1 = scmp.eq.s32.totalorder %s2255_s22, 0 }
   0x9   : > { %p151_p2 = scmp.eq.s32.totalorder %s2255_s22, 1  ;;  %p157_p3 = scmp.eq.s32.totalorder %s1729_s23, 1 }
   0xa   : > { %p2264_p4 = por %p44_p1, %p43_p0  ;;  %p1730_p5 = scmp.ge.s32.totalorder %s2183_s21, 1 }
   0xb   : > { %p2269_p6 = por %p157_p3, %p43_p0  ;;  %p164_p7 = scmp.lt.s32.totalorder %s2183_s21, 3 }
   0xc   : > { %s175_s28 = sshll.u32 %s2846_s1, 4  ;;  %s2185_s30 = smov [#allocation5]   ;;  %s176_s28 = int_to_ptr.hbm [resolvable:$true] %s175_s28 }
   0xd   : > { %p2277_p8 = pnand %p1730_p5, %p164_p7  ;;  %s177_s6 = sshll.u32 %s2185_s30, 4  ;;  %s178_s6 = int_to_ptr.vmem [resolvable:$true] %s177_s6 }
   0xe   : > { %s190_s10 = sshll.u32 %s2847_s2, 4  ;;  %s2186_s11 = smov 256   ;;  %s191_s10 = int_to_ptr.hbm [resolvable:$true] %s190_s10 }
   0xf   : > { %p1847_p9 = pneg %p2277_p8  ;;  %s2187_s12 = smov 16  }
  0x10   : > { %s2188_s13 = smov [#allocation7]   ;;  %s201_s17 = sshll.u32 %s2848_s3, 4  ;;  %s202_s17 = int_to_ptr.hbm [resolvable:$true] %s201_s17 }
  0x11   : > { %p2285_p10 = pnand %p1847_p9, %p44_p1  ;;  %s192_s14 = sshll.u32 %s2188_s13, 4  ;;  %s193_s14 = int_to_ptr.vmem [resolvable:$true] %s192_s14 }
  0x12   : > { %s2189_s23 = smov [#allocation8]   ;;  %s2851_s27 = smov 128  }
  0x13   : > { %1850 = dma.hbm_to_vmem [thread:$0]  (!%p2285_p10), %s176_s28, 1536, %s178_s6, [#allocation6], %s2186_s11, %s2186_s11, %s2187_s12  }
  0x14   : > { %1853 = dma.hbm_to_vmem [thread:$0]  (!%p2285_p10), %s191_s10, 32, %s193_s14, [#allocation6]  }
  0x15   : > { %s203_s26 = sshll.u32 %s2189_s23, 4  ;;  %s2191_s28 = smov 8   ;;  %s204_s26 = int_to_ptr.vmem [resolvable:$true] %s203_s26 }
  0x16   : > { %1856 = dma.hbm_to_vmem [thread:$0]  (!%p2285_p10), %s202_s17, 768, %s204_s26, [#allocation9], %s2851_s27, %s2851_s27, %s2191_s28  }
  0x17   : > { %s2306_s30 = sadd.s32 1, %s2183_s21   ;;  %s30_s8 = sadd.s32 1, %s2179_s20 }
  0x18   : > { %s27_s6 = ssub.s32 %s2183_s21, %s2306_s30  ;;  %p37_p13 = scmp.ne.s32.totalorder %s2179_s20, %s2175_s19 }
  0x19   : > { %p28_p12 = scmp.eq.s32.totalorder %s27_s6, 0  ;;  %p38_p0 = scmp.eq.s32.totalorder %s2183_s21, 0 }
  0x1a   : > { %p2319_p3 = por %p151_p2, %p37_p13  ;;  %p1868_p5 = scmp.lt.s32.totalorder %s2183_s21, 2 }
  0x1b   : > { %s2315_s9 = scalar_select %p28_p12, %s2179_s20, %s30_s8  }
  0x1c   : > { %s220_s7 = sand.u32 1, %s2179_s20   ;;  %s1828_s11 = sshll.u32 %s2183_s21, 5 }
  0x1d   : > { %p39_p7 = por %p38_p0, %p37_p13  ;;  %s1735_s12 = sshll.u32 %s220_s7, 5 }
  0x1e   : > { %s230_s15 = scalar_lea.hbm %s2845_s0, %s1828_s11  ;;  %s224_s17 = scalar_lea.vmem [#allocation2], %s1735_s12 }
  0x1f   : > { %s231_s16 = sshll.u32 %s230_s15, 4  ;;  %s233_s23 = sshll.u32 %s224_s17, 4  ;;  %s232_s16 = int_to_ptr.hbm [resolvable:$true] %s231_s16  ;;  %s234_s23 = int_to_ptr.vmem [resolvable:$true] %s233_s23 }
  0x20   : > { %p2329_p9 = pnand %p1868_p5, %p39_p7  ;;  %s221_s6 = scalar_lea.sflag [#allocation3], %s220_s7 }
  0x21   : > { %s2079_s8 = sshra.s32 %s232_s16, 4  ;;  %s2086_s12 = scalar_lea.hbm %s2845_s0, 64  ;;  %s2080_s8 = int_to_ptr.hbm [resolvable:$true] %s2079_s8 }
  0x22   : > { %s2081_s27 = scalar_lea.hbm %s2080_s8, 32  ;;  %p2083_p10 = pneg %p2329_p9 }
  0x23   : > { %p2082_p2 = scmp.ne.s32.totalorder %s2080_s8, %s2081_s27  ;;  %p2087_p0 = scmp.lt.s32.totalorder %s2080_s8, %s2845_s0 }
  0x24   : > { %p2088_p5 = scmp.lt.s32.totalorder %s2086_s12, %s2081_s27 }
  0x25   : > { %p2084_p12 = pnand %p2083_p10, %p2082_p2 }
  0x26   : > { %p2089_p7 = por %p2088_p5, %p2087_p0 }
  0x27   : > { %p2085_p13 = pneg %p2084_p12 }
  0x29   : > { %p2090_p11 = pnand %p2089_p7, %p2085_p13 }
  0x2b   : > { %2093 = shalt.err (!%p2090_p11)
}
  0x2c   : > { %s2858_s7 = smov 128   ;;  %245 = sbr.rel (%p2277_p8) target bundleno = 1795 (0x703), region = 40 }
  0x2d   : > { %1860 = dma.hbm_to_vmem [thread:$0]  (!%p2329_p9), %s232_s16, 512, %s234_s23, %s221_s6, %s2858_s7, %s2858_s7, %s2191_s28  }
  0x2e   : > { %s2349_s17 = sand.u32 (!%p2277_p8), 1, %s2175_s19  }
  0x2f   : > { %s1740_s27 = sshll.u32 (!%p2277_p8), %s2349_s17, 5  ;;  %s248_s8 = scalar_lea.sflag (!%p2277_p8), [#allocation3], %s2349_s17 }
  0x30   : > { %s251_s11 = scalar_lea.vmem (!%p2277_p8), [#allocation2], %s1740_s27 }
  0x31   : > { %2154 = dma.done.wait (%p2264_p4), %s248_s8, 512  }
  0x32   : > { %2156 = vsyncadd (%p2264_p4), %s248_s8, 4294966784 }
  0x33   : > { %2158 = dma.done.wait (%p44_p1), [#allocation6], 1568  }
  0x34   : > { %2160 = vsyncadd (%p44_p1), [#allocation6], 4294965728 }
  0x35   : > { %2162 = dma.done.wait (%p44_p1), [#allocation9], 768  }
  0x36   : > { %2164 = vsyncadd (%p44_p1), [#allocation9], 4294966528  ;;  %v310_v0 = vld [vmem:[#allocation5 + $0x50] sm:$0xff]  ;;  %v308_v1 = vld [vmem:[#allocation5 + $0x40] sm:$0xff]  ;;  %vm318_vm0 = vcmask 392192   ;;  %s2192_s24 = smov 116  }
  0x37   : > { %341 = vmatpush.msra.mxu0 %v310_v0  ;;  %v306_v2 = vld [vmem:[#allocation5 + $0x30] sm:$0xff]  ;;  %v304_v3 = vld [vmem:[#allocation5 + $0x20] sm:$0xff]  ;;  %v297_v7 = vld [vmem:[%s251_s11 + $0x8] sm:$0xff]  ;;  %s2193_s29 = smov 68   ;;  %s2194_s28 = smov 80   ;;  %vm610_vm1 = vcmask 1043456  }
  0x38   : > { %v302_v4 = vld [vmem:[#allocation5 + $0x10] sm:$0xff]  ;;  %v300_v5 = vld [vmem:[#allocation5] sm:$0xff]  ;;  %v299_v9 = vld [vmem:[%s251_s11 + $0x18] sm:$0xff]  ;;  %s2195_s16 = smov 20   ;;  %s2196_s23 = smov 32   ;;  %vm412_vm2 = vcmask 97280  }
  0x39   : > { %342 = vmatpush.msra.mxu0 %v308_v1  ;;  %v296_v6 = vld [vmem:[%s251_s11] sm:$0xff]  ;;  %v298_v8 = vld [vmem:[%s251_s11 + $0x10] sm:$0xff]  ;;  %v311_v24 = vld [vmem:[#allocation5 + $0x58] sm:$0xff]  ;;  %vm497_vm4 = vcmask 130048   ;;  %s2197_s26 = smov 56   ;;  %s2198_s6 = smov 104  }
  0x3a   : > { %v2371_v10 = vld [vmem:[#allocation7] sm:$0x3]  ;;  %v309_v25 = vld [vmem:[#allocation5 + $0x48] sm:$0xff]  ;;  %370 = vmatpush.msra.mxu1 %v311_v24  ;;  %v307_v26 = vld [vmem:[#allocation5 + $0x38] sm:$0xff]  ;;  %s2199_s13 = smov 8   ;;  %s2200_s12 = smov 44  }
  0x3b   : > { %343 = vmatpush.msra.mxu0 %v306_v2  ;;  %v314_v11 = vperm.slane %v2371_v10, 0  ;;  %v305_v27 = vld [vmem:[#allocation5 + $0x28] sm:$0xff]  ;;  %v303_v28 = vld [vmem:[#allocation5 + $0x18] sm:$0xff]  ;;  %v2455_v57 = vperm.slane %v2371_v10, 1  ;;  %s2201_s14 = smov 92   ;;  %s2202_s15 = smov 124  }
  0x3c   : > { %371 = vmatpush.msra.mxu1 %v309_v25  ;;  %v301_v29 = vld [vmem:[#allocation5 + $0x8] sm:$0xff]  ;;  %v398_v34 = vld [vmem:[#allocation8 + $0x10] sm:$0xff]  ;;  %s293_s11 = scalar_lea.vmem [#allocation10], %s1740_s27 }
  0x3d   : > { %344 = vmatpush.msra.mxu0 %v304_v3  ;;  %v835_v35 = vrot.slane %v398_v34, 4  ;;  %v397_v36 = vld [vmem:[#allocation8 + $0x8] sm:$0xff]  ;;  %v396_v45 = vld [vmem:[#allocation8] sm:$0xff] }
  0x3e   : > { %372 = vmatpush.msra.mxu1 %v307_v26  ;;  %v834_v37 = vrot.slane %v397_v36, 4  ;;  %1761 = vmatpush.msk.msra.mxu2 %vm610_vm1, %v397_v36 }
  0x3f   : > { %345 = vmatpush.msra.mxu0 %v302_v4  ;;  %v389_v4 = vlaneseq }
  0x40   : > { %373 = vmatpush.msra.mxu1 %v305_v27  ;;  %v836_v38 = vsel %vm610_vm1, %v834_v37, %v835_v35  ;;  %629 = vmatpush.msra.mxu2 %v396_v45 }
  0x41   : > { %346 = vmatpush.msra.mxu0 %v300_v5  ;;  %v390_v5 = vshrl.u32 %v389_v4, 7 }
  0x42   : > { %1745 = vmatmul.msk.f32.vlgmr.msra.gmra.mxu0 %vm318_vm0, %v296_v6  ;;  %374 = vmatpush.msra.mxu1 %v303_v28 }
  0x43   : > { %1774 = vmatpush.msk.msrb.mxu0 %vm610_vm1, %v835_v35 }
  0x44   : > { %375 = vmatpush.msra.mxu1 %v301_v29 }
  0x45   : > { %1749 = vmatmul.msk.f32.vlgmr.msra.gmra.mxu1 %vm318_vm0, %v296_v6  ;;  %863 = vmatpush.msrb.mxu0 %v836_v38  ;;  %v393_v6 = vand.u32 127, %v389_v4 }
  0x47   : > { %vm2471_vm3 = vcmp.le.s32.totalorder %v393_v6, %v390_v5 }
  0x4a   : > { %1746 = vmatmul.msk.f32.gmra.mxu0 %vm318_vm0, %v297_v7 }
  0x4d   : > { %1750 = vmatmul.msk.f32.gmra.mxu1 %vm318_vm0, %v297_v7 }
  0x52   : > { %1747 = vmatmul.msk.f32.gmra.mxu0 %vm318_vm0, %v298_v8 }
  0x55   : > { %1751 = vmatmul.msk.f32.gmra.mxu1 %vm318_vm0, %v298_v8 }
  0x5a   : > { %1748 = vmatmul.msk.f32.gmra.mxu0 %vm318_vm0, %v299_v9 }
  0x5d   : > { %1752 = vmatmul.msk.f32.gmra.mxu1 %vm318_vm0, %v299_v9 }
  0xbf   : > { %v348_v12 = vpop.f32.mrf.mxu0 }
  0xc0   : > { %v2374_v13 = vadd.f32 %v348_v12, %v314_v11 }
  0xc2   : > { %v2377_v14 = vmul.f32 0.14433756, %v2374_v13  ;;  %v2450_v55 = vpop.f32.mrf.mxu1 }
  0xc4   : > { %643 = vrot.lane.b32.xlu2 %v2377_v14, %s2192_s24 }
  0xc7   : > { %v351_v15 = vpop.f32.mrf.mxu0 }
  0xc8   : > { %v2380_v16 = vadd.f32 %v351_v15, %v314_v11 }
  0xca   : > { %649 = vrot.lane.b32.xlu1 %v2380_v16, %s2193_s29  ;;  %v2384_v17 = vmul.f32 0.14433756, %v2380_v16  ;;  %v2452_v56 = vpop.f32.mrf.mxu1 }
  0xcc   : > { %645 = vrot.lane.b32.xlu2 %v2384_v17, %s2192_s24 }
  0xcf   : > { %v354_v18 = vpop.f32.mrf.mxu0 }
  0xd0   : > { %v2387_v19 = vadd.f32 %v354_v18, %v314_v11  ;;  %v391_v18 = vadd.s32 8, %v390_v5 }
  0xd2   : > { %647 = vrot.lane.b32.xlu1 %v2374_v13, %s2193_s29  ;;  %v2391_v20 = vmul.f32 0.14433756, %v2387_v19  ;;  %v383_v58 = vpop.f32.mrf.mxu1  ;;  %vm2478_vm5 = vcmp.le.s32.totalorder %v393_v6, %v391_v18 }
  0xd3   : > { %v2458_v59 = vadd.f32 %v383_v58, %v2455_v57 }
  0xd4   : > { %682 = vrot.lane.b32.xlu2 %v2391_v20, %s2192_s24 }
  0xd7   : > { %v357_v21 = vpop.f32.mrf.mxu0 }
  0xd8   : > { %v2394_v22 = vadd.f32 %v357_v21, %v314_v11 }
  0xda   : > { %450 = vrot.lane.b32.xlu0 %v2394_v22, %s2194_s28  ;;  %686 = vrot.lane.b32.xlu1 %v2387_v19, %s2193_s29  ;;  %v2407_v23 = vmul.f32 0.14433756, %v2394_v22  ;;  %v386_v60 = vpop.f32.mrf.mxu1 }
  0xdb   : > { %v2461_v61 = vadd.f32 %v386_v60, %v2455_v57 }
  0xdc   : > { %408 = vrot.lane.b32.xlu2 %v2374_v13, %s2194_s28 }
  0xe2   : > { %448 = vrot.lane.b32.xlu0 %v2387_v19, %s2194_s28  ;;  %410 = vrot.lane.b32.xlu1 %v2380_v16, %s2194_s28 }
  0xe4   : > { %829 = vrot.lane.b32.xlu2 %v2387_v19, %s2195_s16 }
  0xea   : > { %688 = vrot.lane.b32.xlu0 %v2394_v22, %s2193_s29  ;;  %827 = vrot.lane.b32.xlu1 %v2380_v16, %s2195_s16 }
  0xec   : > { %598 = vrot.lane.b32.xlu2 %v2387_v19, %s2196_s23 }
  0xf2   : > { %684 = vrot.lane.b32.xlu0 %v2407_v23, %s2192_s24  ;;  %s1830_s24 = sshll.u32 %s2255_s22, 5  ;;  %s1611_s22 = scalar_lea.sflag [#allocation4], %s2349_s17 }
  0xfa   : > { %825 = vrot.lane.b32.xlu0 %v2374_v13, %s2195_s16 }
 0x102   : > { %831 = vrot.lane.b32.xlu0 %v2394_v22, %s2195_s16  ;;  %s1623_s16 = scalar_lea.hbm %s2850_s5, %s1830_s24 }
 0x10a   : > { %594 = vrot.lane.b32.xlu0 %v2374_v13, %s2196_s23 }
 0x112   : > { %596 = vrot.lane.b32.xlu0 %v2380_v16, %s2196_s23 }
 0x11e   : > { %v644_v30 = vpop.permute.xlu2 %643 }
 0x126   : > { %v646_v32 = vpop.permute.xlu2 %645 }
 0x12e   : > { %v683_v41 = vpop.permute.xlu2 %682 }
 0x136   : > { %v409_v44 = vpop.permute.xlu2 %408 }
 0x13c   : > { %v650_v31 = vpop.permute.xlu1 %649 }
 0x13e   : > { %v830_v51 = vpop.permute.xlu2 %829 }
 0x144   : > { %v648_v33 = vpop.permute.xlu1 %647 }
 0x146   : > { %v599_v54 = vpop.permute.xlu2 %598 }
 0x14c   : > { %v451_v39 = vpop.permute.xlu0 %450  ;;  %v687_v40 = vpop.permute.xlu1 %686 }
 0x14d   : > { %1757 = vmatpush.xpose.msk.msra.mxu3 %vm412_vm2, %v451_v39 }
 0x154   : > { %v449_v42 = vpop.permute.xlu0 %448  ;;  %v411_v43 = vpop.permute.xlu1 %410 }
 0x155   : > { %1753 = vmatpush.xpose.msk.msrb.mxu1 %vm412_vm2, %v411_v43  ;;  %1758 = vmatpush.xpose.msk.msra.mxu3 %vm412_vm2, %v449_v42 }
 0x158   : > { %1759 = vmatmul.msk.f32.vlgmr.msra.gmra.mxu3 %vm412_vm2, %v2391_v20 }
 0x159   : > { %1766 = vmatpush.xpose.msk.msrb.mxu3 %vm412_vm2, %v650_v31  ;;  %1754 = vmatpush.xpose.msk.msrb.mxu1 %vm412_vm2, %v409_v44 }
 0x15c   : > { %v689_v46 = vpop.permute.xlu0 %688  ;;  %1755 = vmatmul.msk.f32.vlgmr.msrb.gmra.mxu1 %vm412_vm2, %v2377_v14  ;;  %v828_v49 = vpop.permute.xlu1 %827 }
 0x15d   : > { %1767 = vmatpush.xpose.msk.msrb.mxu3 %vm412_vm2, %v648_v33 }
 0x160   : > { %1760 = vmatmul.msk.f32.gmra.mxu3 %vm412_vm2, %v2407_v23 }
 0x161   : > { %1770 = vmatpush.xpose.msk.msra.mxu3 %vm412_vm2, %v689_v46 }
 0x164   : > { %v685_v47 = vpop.permute.xlu0 %684  ;;  %1756 = vmatmul.msk.f32.gmra.mxu1 %vm412_vm2, %v2384_v17 }
 0x165   : > { %1771 = vmatpush.xpose.msk.msra.mxu3 %vm412_vm2, %v687_v40 }
 0x168   : > { %1768 = vmatmul.msk.f32.vlgmr.msrb.gmra.mxu3 %vm412_vm2, %v644_v30 }
 0x16c   : > { %v826_v48 = vpop.permute.xlu0 %825 }
 0x16d   : > { %1775 = vmatmul.msk.f32.vlgmr.msrb.gmra.mxu0 %vm412_vm2, %v826_v48 }
 0x170   : > { %1769 = vmatmul.msk.f32.gmra.mxu3 %vm412_vm2, %v646_v32 }
 0x174   : > { %v832_v50 = vpop.permute.xlu0 %831 }
 0x175   : > { %1776 = vmatmul.msk.f32.gmra.mxu0 %vm412_vm2, %v828_v49 }
 0x178   : > { %1772 = vmatmul.msk.f32.vlgmr.msra.gmra.mxu3 %vm412_vm2, %v683_v41 }
 0x17c   : > { %v595_v52 = vpop.permute.xlu0 %594 }
 0x17d   : > { %1762 = vmatmul.msk.f32.vlgmr.msra.gmra.mxu2 %vm412_vm2, %v595_v52  ;;  %1777 = vmatmul.msk.f32.gmra.mxu0 %vm412_vm2, %v830_v51  ;;  %v2522_v51 = vadd.f32 %v2452_v56, %v2455_v57 }
 0x180   : > { %1773 = vmatmul.msk.f32.gmra.mxu3 %vm412_vm2, %v685_v47 }
 0x184   : > { %v597_v53 = vpop.permute.xlu0 %596 }
 0x185   : > { %1763 = vmatmul.msk.f32.gmra.mxu2 %vm412_vm2, %v597_v53  ;;  %1778 = vmatmul.msk.f32.gmra.mxu0 %vm412_vm2, %v832_v50 }
 0x18d   : > { %1764 = vmatmul.msk.f32.gmra.mxu2 %vm412_vm2, %v599_v54 }
 0x1d9   : > { %v440_v35 = vpop.f32.mrf.mxu1 }
 0x1da   : > { %v485_v39 = vadd.f32 10000.0, %v440_v35 }
 0x1db   : > { %v2463_v62 = vpop.f32.mrf.mxu3 }
 0x1dc   : > { %v493_v41 = vsel %vm2471_vm3, %v485_v39, %v440_v35 }
 0x1dd   : > { %v498_v43 = vsel %vm497_vm4, %v493_v41, -inf }
 0x1e1   : > { %v443_v46 = vpop.f32.mrf.mxu1 }
 0x1e2   : > { %v486_v47 = vadd.f32 10000.0, %v443_v46 }
 0x1e3   : > { %v2465_v63 = vpop.f32.mrf.mxu3 }
 0x1e4   : > { %v2510_v48 = vsel %vm2478_vm5, %v486_v47, %v443_v46  ;;  %v488_v46 = vadd.f32 10000.0, %v2465_v63 }
 0x1e5   : > { %v501_v49 = vsel %vm497_vm4, %v2510_v48, -inf }
 0x1e6   : > { %v2567_v47 = vsel %vm2478_vm5, %v488_v46, %v2465_v63  ;;  %v399_v63 = vld [vmem:[#allocation8 + $0x18] sm:$0xff] }
 0x1ea   : > { %v865_v0 = vpop.f32.mrf.mxu0 }
 0x1eb   : > { %v2467_v1 = vpop.f32.mrf.mxu3 }
 0x1f2   : > { %v868_v2 = vpop.f32.mrf.mxu0 }
 0x1f3   : > { %v2469_v3 = vpop.f32.mrf.mxu3  ;;  %897 = vmatpush.msra.mxu1 %v868_v2 }
 0x1f5   : > { %898 = vmatpush.msra.mxu1 %v865_v0 }
 0x1fa   : > { %v871_v7 = vpop.f32.mrf.mxu0 }
 0x1fb   : > { %v715_v8 = vpop.f32.mrf.mxu3 }
 0x1fc   : > { %v723_v9 = vadd.f32 10000.0, %v715_v8 }
 0x1fe   : > { %v727_v11 = vsel %vm2471_vm3, %v723_v9, %v715_v8 }
 0x1ff   : > { %v735_v12 = vsel %vm497_vm4, %v727_v11, -inf }
 0x200   : > { %v631_v15 = vpop.f32.mrf.mxu2  ;;  %736 = vmax.xlane.f32.xlu1 %v735_v12 }
 0x202   : > { %v874_v21 = vpop.f32.mrf.mxu0 }
 0x203   : > { %v718_v24 = vpop.f32.mrf.mxu3  ;;  %926 = vmatpush.msrb.mxu2 %v874_v21 }
 0x204   : > { %v724_v25 = vadd.f32 10000.0, %v718_v24 }
 0x205   : > { %927 = vmatpush.msrb.mxu2 %v871_v7 }
 0x206   : > { %v728_v27 = vsel %vm2478_vm5, %v724_v25, %v718_v24 }
 0x207   : > { %v738_v28 = vsel %vm497_vm4, %v728_v27, -inf }
 0x208   : > { %v634_v29 = vpop.f32.mrf.mxu2  ;;  %739 = vmax.xlane.f32.xlu2 %v738_v28 }
 0x209   : > { %955 = vmatpush.msrb.mxu3 %v634_v29 }
 0x20b   : > { %956 = vmatpush.msrb.mxu3 %v631_v15 }
 0x220   : > { %999 = vrot.lane.b32.xlu2 %v2380_v16, %s2197_s26 }
 0x228   : > { %997 = vrot.lane.b32.xlu2 %v2374_v13, %s2197_s26 }
 0x230   : > { %995 = vrot.lane.b32.xlu2 %v2384_v17, %s2198_s6 }
 0x273   : > { %v737_v30 = vpop.xlane.xlu1 %736 }
 0x274   : > { %v743_v31 = vsub.f32 %v727_v11, %v737_v30 }
 0x276   : > { %v749_v32 = vmul.f32 1.442695, %v743_v31 }
 0x278   : > { %1925 = vpow2.f32 %v749_v32 }
 0x27b   : > { %v740_v33 = vpop.xlane.xlu2 %739 }
 0x27c   : > { %v744_v34 = vsub.f32 %v728_v27, %v740_v33  ;;  %v487_v33 = vadd.f32 10000.0, %v2463_v62 }
 0x27e   : > { %v2491_v36 = vpop.eup %1925  ;;  %v751_v37 = vmul.f32 1.442695, %v744_v34 }
 0x27f   : > { %v759_v38 = vsel %vm497_vm4, %v2491_v36, 0.0 }
 0x280   : > { %1927 = vpow2.f32 %v751_v37  ;;  %760 = vadd.xlane.f32.xlu0 %v759_v38  ;;  %v2540_v37 = vsel %vm2471_vm3, %v487_v33, %v2463_v62  ;;  %v2547_v38 = vadd.f32 %v2450_v55, %v2455_v57  ;;  %v721_v55 = vadd.f32 10000.0, %v2467_v1 }
 0x283   : > { %v1000_v40 = vpop.permute.xlu2 %999 }
 0x284   : > { %1787 = vmatpush.xpose.msk.msra.mxu2 %vm412_vm2, %v1000_v40 }
 0x286   : > { %v2498_v42 = vpop.eup %1927 }
 0x287   : > { %v762_v44 = vsel %vm497_vm4, %v2498_v42, 0.0 }
 0x288   : > { %499 = vmax.xlane.f32.xlu0 %v498_v43  ;;  %763 = vadd.xlane.f32.xlu1 %v762_v44  ;;  %v725_v44 = vsel %vm2471_vm3, %v721_v55, %v2467_v1  ;;  %v2576_v1 = vld [vmem:[#allocation8 + $0x20] sm:$0xff] }
 0x289   : > { %1795 = vmatpush.msk.msra.mxu0 %vm610_vm1, %v2576_v1 }
 0x28b   : > { %v998_v45 = vpop.permute.xlu2 %997  ;;  %1226 = vmatpush.msra.mxu0 %v399_v63 }
 0x28c   : > { %1788 = vmatpush.xpose.msk.msra.mxu2 %vm412_vm2, %v998_v45  ;;  %v729_v45 = vsel %vm497_vm4, %v725_v44, -inf }
 0x293   : > { %v996_v40 = vpop.permute.xlu2 %995 }
 0x29c   : > { %993 = vrot.lane.b32.xlu0 %v2377_v14, %s2198_s6 }
 0x2a1   : > { %600 = vrot.lane.b32.xlu1 %v2394_v22, %s2196_s23  ;;  %s1624_s23 = sshll.u32 %s293_s11, 4  ;;  %s1625_s23 = int_to_ptr.vmem [resolvable:$true] %s1624_s23 }
 0x2cb   : > { %502 = vmax.xlane.f32.xlu1 %v501_v49  ;;  %v507_v49 = vsel %vm497_vm4, %v2567_v47, -inf }
 0x2e4   : > { %1038 = vrot.lane.b32.xlu1 %v2394_v22, %s2197_s26 }
 0x2ec   : > { %1034 = vrot.lane.b32.xlu1 %v2407_v23, %s2198_s6 }
 0x2f3   : > { %v761_v50 = vpop.xlane.xlu0 %760 }
 0x2f4   : > { %1179 = vrot.lane.b32.xlu1 %v2374_v13, %s2199_s13  ;;  %1929 = vrcp.f32 %v761_v50  ;;  %v804_v11 = vand.u32 2147483648, %v761_v50  ;;  %vm798_vm7 = vweird.f32 %v761_v50  ;;  %v802_v12 = vand.u32 2147483647, %v761_v50 }
 0x2f6   : > { %v805_v24 = vor.u32 1.1754944e-38, %v804_v11  ;;  %vm803_vm9 = vcmp.eq.f32.partialorder %v802_v12, 8.507059e+37 }
 0x2fa   : > { %v1930_v60 = vpop.eup %1929 }
 0x2fb   : > { %v500_v52 = vpop.xlane.xlu0 %499  ;;  %v764_v58 = vpop.xlane.xlu1 %763  ;;  %v794_v0 = vmul.f32 %v1930_v60, %v761_v50  ;;  %vm799_vm6 = vweird.f32 %v1930_v60 }
 0x2fc   : > { %v510_v53 = vsub.f32 %v493_v41, %v500_v52  ;;  %1185 = vrot.lane.b32.xlu1 %v2522_v51, %s2199_s13  ;;  %vm800_vm8 = vmor %vm798_vm7, %vm799_vm6  ;;  %v818_v28 = vand.u32 2147483648, %v764_v58  ;;  %vm812_vm11 = vweird.f32 %v764_v58  ;;  %v816_v30 = vand.u32 2147483647, %v764_v58 }
 0x2fd   : > { %v795_v5 = vsub.f32 1.0, %v794_v0  ;;  %vm1195_vm6 = vcmask 64512  }
 0x2fe   : > { %v514_v54 = vmul.f32 1.442695, %v510_v53  ;;  %v819_v32 = vor.u32 1.1754944e-38, %v818_v28  ;;  %vm817_vm13 = vcmp.eq.f32.partialorder %v816_v30, 8.507059e+37 }
 0x2ff   : > { %v796_v6 = vmul.f32 %v1930_v60, %v795_v5 }
 0x300   : > { %1931 = vpow2.f32 %v514_v54 }
 0x301   : > { %1933 = vrcp.f32 %v764_v58  ;;  %v797_v8 = vadd.f32 %v1930_v60, %v796_v6 }
 0x303   : > { %v801_v21 = vsel %vm800_vm8, %v1930_v60, %v797_v8 }
 0x304   : > { %v806_v25 = vsel %vm803_vm9, %v805_v24, %v801_v21  ;;  %v637_v24 = vpop.f32.mrf.mxu2 }
 0x305   : > { %v823_v29 = vmul.f32 %v2491_v36, %v806_v25  ;;  %v504_v36 = vsel %vm497_vm4, %v2540_v37, -inf }
 0x306   : > { %v2526_v2 = vpop.eup %1931 }
 0x307   : > { %v522_v4 = vsel %vm497_vm4, %v2526_v2, 0.0  ;;  %v1934_v56 = vpop.eup %1933 }
 0x308   : > { %523 = vadd.xlane.f32.xlu2 %v522_v4  ;;  %v808_v7 = vmul.f32 %v1934_v56, %v764_v58  ;;  %vm813_vm10 = vweird.f32 %v1934_v56 }
 0x309   : > { %vm814_vm12 = vmor %vm812_vm11, %vm813_vm10 }
 0x30a   : > { %v809_v9 = vsub.f32 1.0, %v808_v7 }
 0x30c   : > { %v810_v18 = vmul.f32 %v1934_v56, %v809_v9 }
 0x30e   : > { %v811_v27 = vadd.f32 %v1934_v56, %v810_v18  ;;  %v994_v39 = vpop.permute.xlu0 %993 }
 0x310   : > { %v815_v31 = vsel %vm814_vm12, %v1934_v56, %v811_v27  ;;  %v722_v56 = vadd.f32 10000.0, %v2469_v3 }
 0x311   : > { %v820_v34 = vsel %vm817_vm13, %v819_v32, %v815_v31 }
 0x312   : > { %v824_v35 = vmul.f32 %v2498_v42, %v820_v34  ;;  %v726_v21 = vsel %vm2478_vm5, %v722_v56, %v2469_v3 }
 0x313   : > { %v601_v15 = vpop.permute.xlu1 %600  ;;  %v732_v25 = vsel %vm497_vm4, %v726_v21, -inf }
 0x314   : > { %1765 = vmatmul.msk.f32.gmra.mxu2 %vm412_vm2, %v601_v15 }
 0x31c   : > { %1781 = vmatmul.msk.f32.vlgmr.msrb.gmra.mxu2 %vm497_vm4, %v823_v29 }
 0x320   : > { %1036 = vrot.lane.b32.xlu2 %v2387_v19, %s2197_s26  ;;  %s1626_s26 = sshll.u32 %s1623_s16, 4  ;;  %s1627_s26 = int_to_ptr.hbm [resolvable:$true] %s1626_s26 }
 0x321   : > { %s2123_s27 = sshra.s32 %s1627_s26, 4  ;;  %s2124_s27 = int_to_ptr.hbm [resolvable:$true] %s2123_s27 }
 0x322   : > { %p2130_p11 = scmp.lt.s32.totalorder %s2124_s27, %s2850_s5 }
 0x324   : > { %1782 = vmatmul.msk.f32.gmra.mxu2 %vm497_vm4, %v824_v35 }
 0x326   : > { %505 = vmax.xlane.f32.xlu1 %v504_v36 }
 0x328   : > { %1181 = vrot.lane.b32.xlu2 %v2547_v38, %s2199_s13 }
 0x32c   : > { %1789 = vmatmul.msk.f32.vlgmr.msra.gmra.mxu2 %vm412_vm2, %v994_v39 }
 0x334   : > { %1790 = vmatmul.msk.f32.gmra.mxu2 %vm412_vm2, %v996_v40 }
 0x33e   : > { %v503_v62 = vpop.xlane.xlu1 %502 }
 0x33f   : > { %v511_v41 = vsub.f32 %v2510_v48, %v503_v62 }
 0x341   : > { %v516_v42 = vmul.f32 1.442695, %v511_v41 }
 0x343   : > { %1935 = vpow2.f32 %v516_v42 }
 0x349   : > { %v2554_v43 = vpop.eup %1935 }
 0x34a   : > { %v525_v57 = vsel %vm497_vm4, %v2554_v43, 0.0 }
 0x34b   : > { %526 = vadd.xlane.f32.xlu0 %v525_v57 }
 0x351   : > { %730 = vmax.xlane.f32.xlu2 %v729_v45 }
 0x356   : > { %v1039_v48 = vpop.permute.xlu1 %1038 }
 0x357   : > { %1791 = vmatpush.xpose.msk.msra.mxu3 %vm412_vm2, %v1039_v48 }
 0x359   : > { %508 = vmax.xlane.f32.xlu2 %v507_v49 }
 0x35e   : > { %v2582_v52 = vpop.permute.xlu1 %1034 }
 0x35f   : > { %1032 = vrot.lane.b32.xlu0 %v2391_v20, %s2198_s6  ;;  %s2125_s6 = scalar_lea.hbm %s2124_s27, 32 }
 0x360   : > { %p2126_p1 = scmp.ne.s32.totalorder %s2124_s27, %s2125_s6 }
 0x362   : > { %p2127_p4 = pnand %p2126_p1, %p2319_p3 }
 0x364   : > { %p2128_p8 = pneg %p2127_p4 }
 0x366   : > { %v1180_v8 = vpop.permute.xlu1 %1179 }
 0x367   : > { %1183 = vrot.lane.b32.xlu0 %v2380_v16, %s2199_s13 }
 0x371   : > { %1187 = vrot.lane.b32.xlu2 %v2387_v19, %s2199_s13 }
 0x37b   : > { %v524_v50 = vpop.xlane.xlu2 %523 }
 0x37c   : > { %1937 = vrcp.f32 %v524_v50  ;;  %v545_v0 = vand.u32 2147483648, %v524_v50  ;;  %v543_v5 = vand.u32 2147483647, %v524_v50  ;;  %vm539_vm15 = vweird.f32 %v524_v50 }
 0x37e   : > { %v546_v7 = vor.u32 1.1754944e-38, %v545_v0  ;;  %vm544_vm8 = vcmp.eq.f32.partialorder %v543_v5, 8.507059e+37 }
 0x382   : > { %v1938_v53 = vpop.eup %1937 }
 0x383   : > { %v535_v54 = vmul.f32 %v1938_v53, %v524_v50  ;;  %v1037_v58 = vpop.permute.xlu2 %1036  ;;  %vm540_vm14 = vweird.f32 %v1938_v53 }
 0x384   : > { %1792 = vmatpush.xpose.msk.msra.mxu3 %vm412_vm2, %v1037_v58  ;;  %vm541_vm7 = vmor %vm539_vm15, %vm540_vm14 }
 0x385   : > { %v536_v60 = vsub.f32 1.0, %v535_v54 }
 0x387   : > { %v537_v4 = vmul.f32 %v1938_v53, %v536_v60  ;;  %v1186_v60 = vpop.permute.xlu1 %1185 }
 0x389   : > { %v538_v6 = vadd.f32 %v1938_v53, %v537_v4 }
 0x38b   : > { %v542_v9 = vsel %vm541_vm7, %v1938_v53, %v538_v6  ;;  %v1182_v11 = vpop.permute.xlu2 %1181 }
 0x38c   : > { %v547_v12 = vsel %vm544_vm8, %v546_v7, %v542_v9  ;;  %v1196_v15 = vsel %vm1195_vm6, %v1180_v8, %v1182_v11 }
 0x38d   : > { %1796 = vmatmul.msk.f32.vlgmr.msra.gmra.mxu0 %vm412_vm2, %v1196_v15  ;;  %v590_v18 = vmul.f32 %v2526_v2, %v547_v12 }
 0x38f   : > { %1783 = vmatmul.msk.f32.vlgmr.msrb.gmra.mxu3 %vm497_vm4, %v590_v18 }
 0x391   : > { %733 = vmax.xlane.f32.xlu0 %v732_v25 }
 0x397   : > { %v640_v27 = vpop.f32.mrf.mxu2 }
 0x398   : > { %984 = vmatpush.msrb.mxu1 %v640_v27 }
 0x39a   : > { %985 = vmatpush.msrb.mxu1 %v637_v24 }
 0x39f   : > { %v2596_v28 = vpop.f32.mrf.mxu2 }
 0x3a5   : > { %1189 = vrot.lane.b32.xlu0 %v2458_v59, %s2199_s13 }
 0x3a7   : > { %v2598_v29 = vpop.f32.mrf.mxu2 }
 0x3af   : > { %v1026_v30 = vpop.f32.mrf.mxu2 }
 0x3b0   : > { %v1071_v34 = vadd.f32 10000.0, %v1026_v30 }
 0x3b2   : > { %v1075_v41 = vsel %vm2471_vm3, %v1071_v34, %v1026_v30 }
 0x3b3   : > { %v1079_v45 = vsel %vm497_vm4, %v1075_v41, -inf }
 0x3b7   : > { %v1029_v57 = vpop.f32.mrf.mxu2 }
 0x3b8   : > { %v1072_v50 = vadd.f32 10000.0, %v1029_v57 }
 0x3ba   : > { %v1076_v54 = vsel %vm2478_vm5, %v1072_v50, %v1029_v57 }
 0x3bb   : > { %v1082_v58 = vsel %vm497_vm4, %v1076_v54, -inf }
 0x3be   : > { %v527_v2 = vpop.xlane.xlu0 %526 }
 0x3bf   : > { %1939 = vrcp.f32 %v527_v2  ;;  %v559_v39 = vand.u32 2147483648, %v527_v2  ;;  %v557_v62 = vand.u32 2147483647, %v527_v2  ;;  %vm553_vm10 = vweird.f32 %v527_v2 }
 0x3c1   : > { %v560_v55 = vor.u32 1.1754944e-38, %v559_v39  ;;  %vm558_vm12 = vcmp.eq.f32.partialorder %v557_v62, 8.507059e+37 }
 0x3c4   : > { %v731_v3 = vpop.xlane.xlu2 %730 }
 0x3c5   : > { %v1940_v31 = vpop.eup %1939  ;;  %v741_v32 = vsub.f32 %v725_v44, %v731_v3 }
 0x3c6   : > { %v549_v33 = vmul.f32 %v1940_v31, %v527_v2  ;;  %vm554_vm9 = vweird.f32 %v1940_v31 }
 0x3c7   : > { %v745_v35 = vmul.f32 1.442695, %v741_v32  ;;  %vm555_vm11 = vmor %vm553_vm10, %vm554_vm9 }
 0x3c8   : > { %v550_v36 = vsub.f32 1.0, %v549_v33 }
 0x3c9   : > { %1941 = vpow2.f32 %v745_v35 }
 0x3ca   : > { %v551_v40 = vmul.f32 %v1940_v31, %v550_v36 }
 0x3cc   : > { %v552_v42 = vadd.f32 %v1940_v31, %v551_v40  ;;  %v509_v8 = vpop.xlane.xlu2 %508 }
 0x3ce   : > { %v556_v44 = vsel %vm555_vm11, %v1940_v31, %v552_v42 }
 0x3cf   : > { %v2603_v46 = vpop.eup %1941  ;;  %1080 = vmax.xlane.f32.xlu0 %v1079_v45  ;;  %v561_v48 = vsel %vm558_vm12, %v560_v55, %v556_v44 }
 0x3d0   : > { %v753_v49 = vsel %vm497_vm4, %v2603_v46, 0.0  ;;  %v591_v63 = vmul.f32 %v2554_v43, %v561_v48  ;;  %v506_v43 = vpop.xlane.xlu1 %505 }
 0x3d1   : > { %v1033_v53 = vpop.permute.xlu0 %1032  ;;  %754 = vadd.xlane.f32.xlu1 %v753_v49  ;;  %v512_v5 = vsub.f32 %v2540_v37, %v506_v43 }
 0x3d2   : > { %1784 = vmatmul.msk.f32.gmra.mxu3 %vm497_vm4, %v591_v63 }
 0x3d3   : > { %v518_v56 = vmul.f32 1.442695, %v512_v5 }
 0x3d5   : > { %1943 = vpow2.f32 %v518_v56 }
 0x3d9   : > { %v1184_v0 = vpop.permute.xlu0 %1183  ;;  %1083 = vmax.xlane.f32.xlu1 %v1082_v58 }
 0x3da   : > { %1793 = vmatmul.msk.f32.vlgmr.msra.gmra.mxu3 %vm412_vm2, %v1033_v53  ;;  %v1197_v4 = vsel %vm1195_vm6, %v1184_v0, %v1186_v60 }
 0x3db   : > { %1797 = vmatmul.msk.f32.gmra.mxu0 %vm412_vm2, %v1197_v4  ;;  %v2622_v11 = vpop.eup %1943 }
 0x3dc   : > { %v528_v12 = vsel %vm497_vm4, %v2622_v11, 0.0 }
 0x3e2   : > { %1794 = vmatmul.msk.f32.gmra.mxu3 %vm412_vm2, %v2582_v52  ;;  %v513_v52 = vsub.f32 %v2567_v47, %v509_v8 }
 0x3e3   : > { %1193 = vrot.lane.b32.xlu0 %v2461_v61, %s2199_s13 }
 0x3e4   : > { %v520_v15 = vmul.f32 1.442695, %v513_v52 }
 0x3f2   : > { %1191 = vrot.lane.b32.xlu1 %v2394_v22, %s2199_s13 }
 0x404   : > { %v734_v6 = vpop.xlane.xlu0 %733 }
 0x405   : > { %v742_v7 = vsub.f32 %v726_v21, %v734_v6  ;;  %v1188_v21 = vpop.permute.xlu2 %1187 }
 0x407   : > { %v747_v9 = vmul.f32 1.442695, %v742_v7 }
 0x409   : > { %1945 = vpow2.f32 %v747_v9 }
 0x40a   : > { %1947 = vpow2.f32 %v520_v15  ;;  %v1228_v39 = vpop.f32.mrf.mxu0 }
 0x40d   : > { %529 = vadd.xlane.f32.xlu0 %v528_v12 }
 0x40f   : > { %v2627_v18 = vpop.eup %1945 }
 0x410   : > { %v756_v37 = vsel %vm497_vm4, %v2627_v18, 0.0  ;;  %v2631_v25 = vpop.eup %1947 }
 0x411   : > { %757 = vadd.xlane.f32.xlu2 %v756_v37  ;;  %v531_v47 = vsel %vm497_vm4, %v2631_v25, 0.0 }
 0x417   : > { %v1190_v24 = vpop.permute.xlu0 %1189 }
 0x418   : > { %v1198_v27 = vsel %vm1195_vm6, %v1188_v21, %v1190_v24 }
 0x419   : > { %1798 = vmatmul.msk.f32.gmra.mxu0 %vm412_vm2, %v1198_v27 }
 0x41c   : > { %532 = vadd.xlane.f32.xlu1 %v531_v47 }
 0x429   : > { %1308 = vrot.lane.b32.xlu2 %v2380_v16, %s2200_s12 }
 0x435   : > { %1306 = vrot.lane.b32.xlu1 %v2374_v13, %s2200_s12 }
 0x43d   : > { %1304 = vrot.lane.b32.xlu1 %v2384_v17, %s2201_s14 }
 0x442   : > { %v1081_v2 = vpop.xlane.xlu0 %1080 }
 0x443   : > { %v1091_v30 = vsub.f32 %v1075_v41, %v1081_v2 }
 0x444   : > { %v755_v3 = vpop.xlane.xlu1 %754 }
 0x445   : > { %v1095_v31 = vmul.f32 1.442695, %v1091_v30  ;;  %1949 = vrcp.f32 %v755_v3  ;;  %1341 = vrot.lane.b32.xlu1 %v2391_v20, %s2201_s14  ;;  %v776_v17 = vand.u32 2147483648, %v755_v3  ;;  %v774_v62 = vand.u32 2147483647, %v755_v3 }
 0x446   : > { %vm770_vm14 = vweird.f32 %v755_v3 }
 0x447   : > { %1951 = vpow2.f32 %v1095_v31  ;;  %v777_v42 = vor.u32 1.1754944e-38, %v776_v17  ;;  %vm775_vm7 = vcmp.eq.f32.partialorder %v774_v62, 8.507059e+37 }
 0x44b   : > { %v1950_v32 = vpop.eup %1949 }
 0x44c   : > { %v766_v33 = vmul.f32 %v1950_v32, %v755_v3  ;;  %v1084_v34 = vpop.xlane.xlu1 %1083  ;;  %vm771_vm13 = vweird.f32 %v1950_v32 }
 0x44d   : > { %v1092_v16 = vsub.f32 %v1076_v54, %v1084_v34  ;;  %1343 = vrot.lane.b32.xlu1 %v2407_v23, %s2201_s14  ;;  %v2647_v13 = vpop.eup %1951  ;;  %vm772_vm15 = vmor %vm770_vm14, %vm771_vm13 }
 0x44e   : > { %v767_v35 = vsub.f32 1.0, %v766_v33  ;;  %v1103_v20 = vsel %vm497_vm4, %v2647_v13, 0.0 }
 0x44f   : > { %v1097_v36 = vmul.f32 1.442695, %v1092_v16 }
 0x450   : > { %v768_v40 = vmul.f32 %v1950_v32, %v767_v35 }
 0x451   : > { %1953 = vpow2.f32 %v1097_v36 }
 0x452   : > { %v769_v41 = vadd.f32 %v1950_v32, %v768_v40  ;;  %1104 = vadd.xlane.f32.xlu2 %v1103_v20 }
 0x454   : > { %v773_v55 = vsel %vm772_vm15, %v1950_v32, %v769_v41 }
 0x455   : > { %v778_v23 = vsel %vm775_vm7, %v777_v42, %v773_v55  ;;  %v1194_v49 = vpop.permute.xlu0 %1193 }
 0x456   : > { %v821_v57 = vmul.f32 %v2603_v46, %v778_v23  ;;  %v2665_v46 = vpop.f32.mrf.mxu3 }
 0x457   : > { %v2652_v45 = vpop.eup %1953 }
 0x458   : > { %1779 = vmatmul.msk.f32.vlgmr.msra.gmra.mxu1 %vm497_vm4, %v821_v57  ;;  %v1231_v44 = vpop.f32.mrf.mxu0  ;;  %v1106_v48 = vsel %vm497_vm4, %v2652_v45, 0.0 }
 0x459   : > { %1260 = vmatpush.msra.mxu1 %v1231_v44  ;;  %1107 = vadd.xlane.f32.xlu0 %v1106_v48 }
 0x45b   : > { %1261 = vmatpush.msra.mxu1 %v1228_v39 }
 0x45e   : > { %v2667_v53 = vpop.f32.mrf.mxu3 }
 0x464   : > { %v1192_v63 = vpop.permute.xlu1 %1191 }
 0x465   : > { %v1199_v50 = vsel %vm1195_vm6, %v1192_v63, %v1194_v49 }
 0x466   : > { %1799 = vmatmul.msk.f32.gmra.mxu0 %vm412_vm2, %v1199_v50  ;;  %v1065_v60 = vpop.f32.mrf.mxu3 }
 0x467   : > { %v1073_v6 = vadd.f32 10000.0, %v1065_v60 }
 0x469   : > { %v2672_v24 = vsel %vm2471_vm3, %v1073_v6, %v1065_v60 }
 0x46a   : > { %1347 = vrot.lane.b32.xlu2 %v2394_v22, %s2200_s12  ;;  %v1085_v32 = vsel %vm497_vm4, %v2672_v24, -inf }
 0x46d   : > { %1302 = vrot.lane.b32.xlu0 %v2377_v14, %s2201_s14 }
 0x46e   : > { %v1068_v9 = vpop.f32.mrf.mxu3 }
 0x46f   : > { %v1074_v37 = vadd.f32 10000.0, %v1068_v9 }
 0x471   : > { %v2679_v16 = vsel %vm2478_vm5, %v1074_v37, %v1068_v9 }
 0x472   : > { %1345 = vrot.lane.b32.xlu2 %v2387_v19, %s2200_s12  ;;  %v1088_v39 = vsel %vm497_vm4, %v2679_v16, -inf }
 0x480   : > { %v530_v54 = vpop.xlane.xlu0 %529 }
 0x481   : > { %1955 = vrcp.f32 %v530_v54  ;;  %v573_v2 = vand.u32 2147483648, %v530_v54  ;;  %vm567_vm12 = vweird.f32 %v530_v54  ;;  %v571_v31 = vand.u32 2147483647, %v530_v54 }
 0x483   : > { %v574_v17 = vor.u32 1.1754944e-38, %v573_v2  ;;  %vm572_vm14 = vcmp.eq.f32.partialorder %v571_v31, 8.507059e+37 }
 0x484   : > { %v758_v58 = vpop.xlane.xlu2 %757 }
 0x485   : > { %1957 = vrcp.f32 %v758_v58  ;;  %v790_v19 = vand.u32 2147483648, %v758_v58  ;;  %v788_v8 = vand.u32 2147483647, %v758_v58  ;;  %vm784_vm8 = vweird.f32 %v758_v58 }
 0x487   : > { %v1956_v0 = vpop.eup %1955  ;;  %v791_v21 = vor.u32 1.1754944e-38, %v790_v19  ;;  %vm789_vm11 = vcmp.eq.f32.partialorder %v788_v8, 8.507059e+37 }
 0x488   : > { %v563_v4 = vmul.f32 %v1956_v0, %v530_v54  ;;  %vm568_vm10 = vweird.f32 %v1956_v0 }
 0x489   : > { %vm569_vm13 = vmor %vm567_vm12, %vm568_vm10 }
 0x48a   : > { %v564_v5 = vsub.f32 1.0, %v563_v4 }
 0x48b   : > { %v1958_v43 = vpop.eup %1957 }
 0x48c   : > { %v780_v22 = vmul.f32 %v1958_v43, %v758_v58  ;;  %v1309_v56 = vpop.permute.xlu2 %1308  ;;  %v565_v52 = vmul.f32 %v1956_v0, %v564_v5  ;;  %vm785_vm6 = vweird.f32 %v1958_v43 }
 0x48d   : > { %1804 = vmatpush.xpose.msk.msrb.mxu3 %vm412_vm2, %v1309_v56  ;;  %vm786_vm9 = vmor %vm784_vm8, %vm785_vm6 }
 0x48e   : > { %v781_v14 = vsub.f32 1.0, %v780_v22  ;;  %v566_v27 = vadd.f32 %v1956_v0, %v565_v52 }
 0x48f   : > { %v533_v7 = vpop.xlane.xlu1 %532 }
 0x490   : > { %v782_v12 = vmul.f32 %v1958_v43, %v781_v14  ;;  %1959 = vrcp.f32 %v533_v7  ;;  %v570_v35 = vsel %vm569_vm13, %v1956_v0, %v566_v27  ;;  %vm581_vm7 = vweird.f32 %v533_v7 }
 0x491   : > { %v575_v40 = vsel %vm572_vm14, %v574_v17, %v570_v35  ;;  %v585_v42 = vand.u32 2147483647, %v533_v7 }
 0x492   : > { %v783_v15 = vadd.f32 %v1958_v43, %v782_v12  ;;  %v592_v41 = vmul.f32 %v2622_v11, %v575_v40 }
 0x493   : > { %vm586_vm8 = vcmp.eq.f32.partialorder %v585_v42, 8.507059e+37 }
 0x494   : > { %v787_v47 = vsel %vm786_vm9, %v1958_v43, %v783_v15 }
 0x495   : > { %v792_v30 = vsel %vm789_vm11, %v791_v21, %v787_v47 }
 0x496   : > { %v1960_v3 = vpop.eup %1959  ;;  %v822_v33 = vmul.f32 %v2627_v18, %v792_v30  ;;  %v587_v18 = vand.u32 2147483648, %v533_v7  ;;  %v1234_v12 = vpop.f32.mrf.mxu0 }
 0x497   : > { %v577_v34 = vmul.f32 %v1960_v3, %v533_v7  ;;  %1086 = vmax.xlane.f32.xlu0 %v1085_v32  ;;  %vm582_vm15 = vweird.f32 %v1960_v3 }
 0x498   : > { %1780 = vmatmul.msk.f32.gmra.mxu1 %vm497_vm4, %v822_v33  ;;  %vm583_vm6 = vmor %vm581_vm7, %vm582_vm15  ;;  %v588_v23 = vor.u32 1.1754944e-38, %v587_v18 }
 0x499   : > { %v578_v36 = vsub.f32 1.0, %v577_v34 }
 0x49b   : > { %v579_v62 = vmul.f32 %v1960_v3, %v578_v36  ;;  %1089 = vmax.xlane.f32.xlu2 %v1088_v39 }
 0x49d   : > { %v580_v20 = vadd.f32 %v1960_v3, %v579_v62 }
 0x49f   : > { %v584_v55 = vsel %vm583_vm6, %v1960_v3, %v580_v20 }
 0x4a0   : > { %1785 = vmatmul.msk.f32.vlgmr.msrb.gmra.mxu1 %vm497_vm4, %v592_v41  ;;  %v589_v57 = vsel %vm586_vm8, %v588_v23, %v584_v55 }
 0x4a1   : > { %v593_v44 = vmul.f32 %v2631_v25, %v589_v57 }
 0x4a7   : > { %v1307_v48 = vpop.permute.xlu1 %1306 }
 0x4a8   : > { %1786 = vmatmul.msk.f32.gmra.mxu1 %vm497_vm4, %v593_v44  ;;  %1805 = vmatpush.xpose.msk.msrb.mxu3 %vm412_vm2, %v1307_v48 }
 0x4af   : > { %v1305_v37 = vpop.permute.xlu1 %1304 }
 0x4b3   : > { %1486 = vrot.lane.b32.xlu2 %v2522_v51, %s2202_s15 }
 0x4b7   : > { %v1342_v30 = vpop.permute.xlu1 %1341 }
 0x4bf   : > { %v1344_v3 = vpop.permute.xlu1 %1343 }
 0x4c5   : > { %v1105_v11 = vpop.xlane.xlu2 %1104 }
 0x4c6   : > { %1961 = vrcp.f32 %v1105_v11  ;;  %v1126_v25 = vand.u32 2147483648, %v1105_v11  ;;  %v1124_v0 = vand.u32 2147483647, %v1105_v11  ;;  %vm1120_vm10 = vweird.f32 %v1105_v11 }
 0x4c8   : > { %v1127_v5 = vor.u32 1.1754944e-38, %v1126_v25  ;;  %vm1125_vm12 = vcmp.eq.f32.partialorder %v1124_v0, 8.507059e+37  ;;  %v401_v0 = vld [vmem:[#allocation8 + $0x28] sm:$0xff] }
 0x4cc   : > { %v1962_v49 = vpop.eup %1961  ;;  %v1108_v63 = vpop.xlane.xlu0 %1107 }
 0x4cd   : > { %v1116_v50 = vmul.f32 %v1962_v49, %v1105_v11  ;;  %1963 = vrcp.f32 %v1108_v63  ;;  %v1348_v54 = vpop.permute.xlu2 %1347  ;;  %vm1121_vm9 = vweird.f32 %v1962_v49  ;;  %v1140_v19 = vand.u32 2147483648, %v1108_v63 }
 0x4ce   : > { %1808 = vmatpush.xpose.msk.msrb.mxu1 %vm412_vm2, %v1348_v54  ;;  %vm1122_vm11 = vmor %vm1120_vm10, %vm1121_vm9  ;;  %v1138_v9 = vand.u32 2147483647, %v1108_v63  ;;  %vm1134_vm14 = vweird.f32 %v1108_v63 }
 0x4cf   : > { %v1117_v58 = vsub.f32 1.0, %v1116_v50  ;;  %v1141_v15 = vor.u32 1.1754944e-38, %v1140_v19 }
 0x4d0   : > { %vm1139_vm7 = vcmp.eq.f32.partialorder %v1138_v9, 8.507059e+37 }
 0x4d1   : > { %v1118_v60 = vmul.f32 %v1962_v49, %v1117_v58 }
 0x4d3   : > { %v1964_v4 = vpop.eup %1963  ;;  %v1119_v43 = vadd.f32 %v1962_v49, %v1118_v60 }
 0x4d4   : > { %v1130_v51 = vmul.f32 %v1964_v4, %v1108_v63  ;;  %vm1135_vm13 = vweird.f32 %v1964_v4 }
 0x4d5   : > { %v1123_v22 = vsel %vm1122_vm11, %v1962_v49, %v1119_v43  ;;  %v1346_v56 = vpop.permute.xlu2 %1345  ;;  %vm1136_vm15 = vmor %vm1134_vm14, %vm1135_vm13 }
 0x4d6   : > { %v1128_v14 = vsel %vm1125_vm12, %v1127_v5, %v1123_v22  ;;  %v1131_v6 = vsub.f32 1.0, %v1130_v51  ;;  %1809 = vmatpush.xpose.msk.msrb.mxu1 %vm412_vm2, %v1346_v56  ;;  %v1494_v5 = vrot.slane %v401_v0, 4 }
 0x4d7   : > { %v1171_v7 = vmul.f32 %v2647_v13, %v1128_v14 }
 0x4d8   : > { %v1132_v8 = vmul.f32 %v1964_v4, %v1131_v6 }
 0x4d9   : > { %1800 = vmatmul.msk.f32.vlgmr.msra.gmra.mxu1 %vm497_vm4, %v1171_v7 }
 0x4da   : > { %v1133_v52 = vadd.f32 %v1964_v4, %v1132_v8 }
 0x4dc   : > { %v1137_v21 = vsel %vm1136_vm15, %v1964_v4, %v1133_v52  ;;  %v1493_v4 = vrot.slane %v2576_v1, 4 }
 0x4dd   : > { %v1142_v27 = vsel %vm1139_vm7, %v1141_v15, %v1137_v21 }
 0x4de   : > { %v1172_v47 = vmul.f32 %v2652_v45, %v1142_v27  ;;  %v1495_v51 = vsel %vm610_vm1, %v1493_v4, %v1494_v5 }
 0x4df   : > { %v1303_v2 = vpop.permute.xlu0 %1302 }
 0x4e0   : > { %1806 = vmatmul.msk.f32.vlgmr.msrb.gmra.mxu3 %vm412_vm2, %v1303_v2 }
 0x4e1   : > { %1801 = vmatmul.msk.f32.gmra.mxu1 %vm497_vm4, %v1172_v47 }
 0x4e3   : > { %v1237_v13 = vpop.f32.mrf.mxu0 }
 0x4e4   : > { %1289 = vmatpush.msrb.mxu2 %v1237_v13 }
 0x4e6   : > { %1290 = vmatpush.msrb.mxu2 %v1234_v12 }
 0x4e8   : > { %1807 = vmatmul.msk.f32.gmra.mxu3 %vm412_vm2, %v1305_v37  ;;  %1812 = vmatpush.msk.msra.mxu2 %vm610_vm1, %v1494_v5 }
 0x4e9   : > { %1810 = vmatmul.msk.f32.vlgmr.msrb.gmra.mxu1 %vm412_vm2, %v1342_v30 }
 0x4ea   : > { %1522 = vmatpush.msra.mxu2 %v1495_v51 }
 0x4f1   : > { %1811 = vmatmul.msk.f32.gmra.mxu1 %vm412_vm2, %v1344_v3 }
 0x50a   : > { %v1087_v31 = vpop.xlane.xlu0 %1086 }
 0x50b   : > { %v1093_v32 = vsub.f32 %v2672_v24, %v1087_v31  ;;  %v900_v24 = vpop.f32.mrf.mxu1 }
 0x50c   : > { %v959_v20 = vadd.f32 %v2665_v46, %v900_v24 }
 0x50d   : > { %v1099_v45 = vmul.f32 1.442695, %v1093_v32 }
 0x50e   : > { %v1090_v33 = vpop.xlane.xlu2 %1089 }
 0x50f   : > { %1965 = vpow2.f32 %v1099_v45  ;;  %v1094_v34 = vsub.f32 %v2679_v16, %v1090_v33 }
 0x511   : > { %v1101_v35 = vmul.f32 1.442695, %v1094_v34 }
 0x513   : > { %1967 = vpow2.f32 %v1101_v35 }
 0x515   : > { %v2703_v17 = vpop.eup %1965  ;;  %v903_v16 = vpop.f32.mrf.mxu1 }
 0x516   : > { %v1109_v36 = vsel %vm497_vm4, %v2703_v17, 0.0  ;;  %v962_v55 = vadd.f32 %v2667_v53, %v903_v16  ;;  %v1487_v33 = vpop.permute.xlu2 %1486 }
 0x517   : > { %1110 = vadd.xlane.f32.xlu1 %v1109_v36 }
 0x519   : > { %v2707_v39 = vpop.eup %1967 }
 0x51a   : > { %v1112_v40 = vsel %vm497_vm4, %v2707_v39, 0.0 }
 0x51b   : > { %1113 = vadd.xlane.f32.xlu0 %v1112_v40 }
 0x51d   : > { %v2717_v62 = vpop.f32.mrf.mxu1 }
 0x525   : > { %v2719_v18 = vpop.f32.mrf.mxu1 }
 0x52f   : > { %1484 = vrot.lane.b32.xlu0 %v2547_v38, %s2202_s15 }
 0x530   : > { %1490 = vrot.lane.b32.xlu1 %v2461_v61, %s2202_s15 }
 0x537   : > { %1488 = vrot.lane.b32.xlu0 %v2458_v59, %s2202_s15  ;;  %s2129_s15 = scalar_lea.hbm %s2850_s5, 64 }
 0x538   : > { %p2131_p9 = scmp.lt.s32.totalorder %s2129_s15, %s2125_s6 }
 0x53a   : > { %p2132_p2 = por %p2131_p9, %p2130_p11 }
 0x53c   : > { %p2133_p10 = pnand %p2132_p2, %p2128_p8 }
 0x556   : > { %v1263_v41 = vpop.f32.mrf.mxu1 }
 0x557   : > { %v2722_v42 = vadd.f32 %v1263_v41, %v959_v20 }
 0x55e   : > { %v1266_v38 = vpop.f32.mrf.mxu1 }
 0x55f   : > { %v2725_v23 = vadd.f32 %v1266_v38, %v962_v55 }
 0x563   : > { %v1335_v61 = vpop.f32.mrf.mxu3 }
 0x564   : > { %v1380_v57 = vadd.f32 10000.0, %v1335_v61 }
 0x566   : > { %v1374_v44 = vpop.f32.mrf.mxu1  ;;  %v2729_v59 = vsel %vm2471_vm3, %v1380_v57, %v1335_v61 }
 0x567   : > { %v1382_v48 = vadd.f32 10000.0, %v1374_v44  ;;  %v1388_v11 = vsel %vm497_vm4, %v2729_v59, -inf }
 0x568   : > { %1389 = vmax.xlane.f32.xlu2 %v1388_v11 }
 0x569   : > { %v2735_v46 = vsel %vm2471_vm3, %v1382_v48, %v1374_v44 }
 0x56a   : > { %v1394_v53 = vsel %vm497_vm4, %v2735_v46, -inf }
 0x56b   : > { %v1338_v49 = vpop.f32.mrf.mxu3  ;;  %1395 = vmax.xlane.f32.xlu0 %v1394_v53 }
 0x56c   : > { %v1381_v63 = vadd.f32 10000.0, %v1338_v49 }
 0x56e   : > { %v1377_v50 = vpop.f32.mrf.mxu1  ;;  %v2741_v54 = vsel %vm2478_vm5, %v1381_v63, %v1338_v49 }
 0x56f   : > { %v1383_v58 = vadd.f32 10000.0, %v1377_v50  ;;  %v1391_v25 = vsel %vm497_vm4, %v2741_v54, -inf }
 0x570   : > { %1392 = vmax.xlane.f32.xlu1 %v1391_v25  ;;  %v991_v25 = vadd.f32 %v2719_v18, %v2598_v29 }
 0x571   : > { %v2747_v10 = vsel %vm2478_vm5, %v1383_v58, %v1377_v50  ;;  %v988_v50 = vadd.f32 %v2717_v62, %v2596_v28 }
 0x572   : > { %v1397_v60 = vsel %vm497_vm4, %v2747_v10, -inf }
 0x573   : > { %1398 = vmax.xlane.f32.xlu2 %v1397_v60 }
 0x58a   : > { %v1111_v43 = vpop.xlane.xlu1 %1110 }
 0x58b   : > { %1969 = vrcp.f32 %v1111_v43  ;;  %v1154_v19 = vand.u32 2147483648, %v1111_v43  ;;  %v1152_v8 = vand.u32 2147483647, %v1111_v43  ;;  %vm1148_vm5 = vweird.f32 %v1111_v43 }
 0x58d   : > { %v1155_v12 = vor.u32 1.1754944e-38, %v1154_v19  ;;  %vm1153_vm8 = vcmp.eq.f32.partialorder %v1152_v8, 8.507059e+37 }
 0x58e   : > { %v1114_v22 = vpop.xlane.xlu0 %1113 }
 0x58f   : > { %1971 = vrcp.f32 %v1114_v22  ;;  %v1168_v27 = vand.u32 2147483648, %v1114_v22  ;;  %vm1162_vm9 = vweird.f32 %v1114_v22  ;;  %v1166_v13 = vand.u32 2147483647, %v1114_v22 }
 0x591   : > { %v1970_v26 = vpop.eup %1969  ;;  %v1169_v3 = vor.u32 1.1754944e-38, %v1168_v27  ;;  %vm1167_vm11 = vcmp.eq.f32.partialorder %v1166_v13, 8.507059e+37 }
 0x592   : > { %v1144_v56 = vmul.f32 %v1970_v26, %v1111_v43  ;;  %vm1149_vm3 = vweird.f32 %v1970_v26 }
 0x593   : > { %vm1150_vm6 = vmor %vm1148_vm5, %vm1149_vm3 }
 0x594   : > { %v1145_v14 = vsub.f32 1.0, %v1144_v56 }
 0x595   : > { %v1972_v6 = vpop.eup %1971 }
 0x596   : > { %v1146_v7 = vmul.f32 %v1970_v26, %v1145_v14  ;;  %v1158_v9 = vmul.f32 %v1972_v6, %v1114_v22  ;;  %vm1163_vm1 = vweird.f32 %v1972_v6 }
 0x597   : > { %vm1164_vm10 = vmor %vm1162_vm9, %vm1163_vm1 }
 0x598   : > { %v1147_v1 = vadd.f32 %v1970_v26, %v1146_v7  ;;  %v1159_v52 = vsub.f32 1.0, %v1158_v9 }
 0x59a   : > { %v1151_v15 = vsel %vm1150_vm6, %v1970_v26, %v1147_v1  ;;  %v1160_v37 = vmul.f32 %v1972_v6, %v1159_v52 }
 0x59b   : > { %v1156_v21 = vsel %vm1153_vm8, %v1155_v12, %v1151_v15 }
 0x59c   : > { %v1173_v47 = vmul.f32 %v2703_v17, %v1156_v21  ;;  %v1161_v2 = vadd.f32 %v1972_v6, %v1160_v37 }
 0x59e   : > { %1802 = vmatmul.msk.f32.vlgmr.msrb.gmra.mxu2 %vm497_vm4, %v1173_v47  ;;  %v1165_v30 = vsel %vm1164_vm10, %v1972_v6, %v1161_v2 }
 0x59f   : > { %v1170_v31 = vsel %vm1167_vm11, %v1169_v3, %v1165_v30 }
 0x5a0   : > { %v1174_v32 = vmul.f32 %v2707_v39, %v1170_v31 }
 0x5a1   : > { %v1485_v45 = vpop.permute.xlu0 %1484 }
 0x5a2   : > { %v1491_v35 = vpop.permute.xlu1 %1490 }
 0x5a6   : > { %1803 = vmatmul.msk.f32.gmra.mxu2 %vm497_vm4, %v1174_v32 }
 0x5a9   : > { %v1489_v34 = vpop.permute.xlu0 %1488 }
 0x5ae   : > { %1813 = vmatmul.msk.f32.vlgmr.msra.gmra.mxu2 %vm412_vm2, %v1485_v45 }
 0x5b6   : > { %1814 = vmatmul.msk.f32.gmra.mxu2 %vm412_vm2, %v1487_v33 }
 0x5be   : > { %1815 = vmatmul.msk.f32.gmra.mxu2 %vm412_vm2, %v1489_v34 }
 0x5c6   : > { %1816 = vmatmul.msk.f32.gmra.mxu2 %vm412_vm2, %v1491_v35 }
 0x5db   : > { %v1390_v17 = vpop.xlane.xlu2 %1389 }
 0x5dc   : > { %v1400_v36 = vsub.f32 %v2729_v59, %v1390_v17 }
 0x5de   : > { %v1404_v40 = vmul.f32 1.442695, %v1400_v36  ;;  %v1396_v24 = vpop.xlane.xlu0 %1395 }
 0x5df   : > { %v1402_v39 = vsub.f32 %v2735_v46, %v1396_v24 }
 0x5e0   : > { %1973 = vpow2.f32 %v1404_v40 }
 0x5e1   : > { %v1408_v16 = vmul.f32 1.442695, %v1402_v39 }
 0x5e3   : > { %1975 = vpow2.f32 %v1408_v16  ;;  %v1393_v20 = vpop.xlane.xlu1 %1392 }
 0x5e4   : > { %v1401_v41 = vsub.f32 %v2741_v54, %v1393_v20 }
 0x5e6   : > { %v2765_v55 = vpop.eup %1973  ;;  %v1406_v38 = vmul.f32 1.442695, %v1401_v41  ;;  %v1399_v61 = vpop.xlane.xlu2 %1398 }
 0x5e7   : > { %v1403_v57 = vsub.f32 %v2747_v10, %v1399_v61  ;;  %v1412_v44 = vsel %vm497_vm4, %v2765_v55, 0.0 }
 0x5e8   : > { %1977 = vpow2.f32 %v1406_v38  ;;  %1413 = vadd.xlane.f32.xlu0 %v1412_v44 }
 0x5e9   : > { %v2770_v59 = vpop.eup %1975  ;;  %v1410_v48 = vmul.f32 1.442695, %v1403_v57 }
 0x5ea   : > { %v1418_v11 = vsel %vm497_vm4, %v2770_v59, 0.0 }
 0x5eb   : > { %1979 = vpow2.f32 %v1410_v48  ;;  %1419 = vadd.xlane.f32.xlu2 %v1418_v11 }
 0x5ee   : > { %v2774_v46 = vpop.eup %1977 }
 0x5ef   : > { %v1415_v53 = vsel %vm497_vm4, %v2774_v46, 0.0 }
 0x5f0   : > { %1416 = vadd.xlane.f32.xlu0 %v1415_v53  ;;  %v1924_v53 = vld [vmem:[%s2849_s4] ss:$0 sm:$0xff] }
 0x5f1   : > { %v2778_v49 = vpop.eup %1979 }
 0x5f2   : > { %v1421_v63 = vsel %vm497_vm4, %v2778_v49, 0.0 }
 0x5f3   : > { %1422 = vadd.xlane.f32.xlu2 %v1421_v63 }
 0x621   : > { %v1292_v54 = vpop.f32.mrf.mxu2 }
 0x622   : > { %v2784_v58 = vadd.f32 %v1292_v54, %v988_v50 }
 0x629   : > { %v1295_v10 = vpop.f32.mrf.mxu2 }
 0x62a   : > { %v2788_v60 = vadd.f32 %v1295_v10, %v991_v25 }
 0x631   : > { %v1524_v0 = vpop.f32.mrf.mxu2 }
 0x639   : > { %v1527_v4 = vpop.f32.mrf.mxu2 }
 0x63a   : > { %1556 = vmatpush.msra.mxu3 %v1527_v4 }
 0x63c   : > { %1557 = vmatpush.msra.mxu3 %v1524_v0 }
 0x641   : > { %v1530_v43 = vpop.f32.mrf.mxu2 }
 0x649   : > { %v1533_v5 = vpop.f32.mrf.mxu2 }
 0x64a   : > { %1585 = vmatpush.msrb.mxu0 %v1533_v5 }
 0x64c   : > { %1586 = vmatpush.msrb.mxu0 %v1530_v43 }
 0x65b   : > { %v1414_v51 = vpop.xlane.xlu0 %1413 }
 0x65c   : > { %1981 = vrcp.f32 %v1414_v51  ;;  %v1435_v56 = vand.u32 2147483648, %v1414_v51  ;;  %v1433_v7 = vand.u32 2147483647, %v1414_v51  ;;  %vm1429_vm12 = vweird.f32 %v1414_v51 }
 0x65e   : > { %v1420_v28 = vpop.xlane.xlu2 %1419  ;;  %v1436_v12 = vor.u32 1.1754944e-38, %v1435_v56  ;;  %vm1434_vm15 = vcmp.eq.f32.partialorder %v1433_v7, 8.507059e+37 }
 0x65f   : > { %1983 = vrcp.f32 %v1420_v28  ;;  %v1463_v1 = vand.u32 2147483648, %v1420_v28  ;;  %v1461_v37 = vand.u32 2147483647, %v1420_v28  ;;  %vm1457_vm7 = vweird.f32 %v1420_v28 }
 0x661   : > { %v1464_v30 = vor.u32 1.1754944e-38, %v1463_v1  ;;  %vm1462_vm5 = vcmp.eq.f32.partialorder %v1461_v37, 8.507059e+37 }
 0x662   : > { %v1982_v62 = vpop.eup %1981 }
 0x663   : > { %v1425_v22 = vmul.f32 %v1982_v62, %v1414_v51  ;;  %v1417_v26 = vpop.xlane.xlu0 %1416  ;;  %vm1430_vm2 = vweird.f32 %v1982_v62 }
 0x664   : > { %1985 = vrcp.f32 %v1417_v26  ;;  %vm1431_vm13 = vmor %vm1429_vm12, %vm1430_vm2  ;;  %v1449_v45 = vand.u32 2147483648, %v1417_v26  ;;  %v1447_v17 = vand.u32 2147483647, %v1417_v26  ;;  %vm1443_vm8 = vweird.f32 %v1417_v26 }
 0x665   : > { %v1984_v29 = vpop.eup %1983  ;;  %v1426_v18 = vsub.f32 1.0, %v1425_v22 }
 0x666   : > { %v1453_v14 = vmul.f32 %v1984_v29, %v1420_v28  ;;  %v1423_v6 = vpop.xlane.xlu2 %1422  ;;  %vm1458_vm14 = vweird.f32 %v1984_v29  ;;  %v1450_v16 = vor.u32 1.1754944e-38, %v1449_v45  ;;  %vm1448_vm10 = vcmp.eq.f32.partialorder %v1447_v17, 8.507059e+37 }
 0x667   : > { %v1427_v19 = vmul.f32 %v1982_v62, %v1426_v18  ;;  %1987 = vrcp.f32 %v1423_v6  ;;  %vm1459_vm3 = vmor %vm1457_vm7, %vm1458_vm14  ;;  %v1477_v39 = vand.u32 2147483648, %v1423_v6  ;;  %v1475_v41 = vand.u32 2147483647, %v1423_v6 }
 0x668   : > { %v1454_v8 = vsub.f32 1.0, %v1453_v14  ;;  %vm1471_vm11 = vweird.f32 %v1423_v6 }
 0x669   : > { %v1428_v9 = vadd.f32 %v1982_v62, %v1427_v19  ;;  %v1478_v57 = vor.u32 1.1754944e-38, %v1477_v39  ;;  %vm1476_vm12 = vcmp.eq.f32.partialorder %v1475_v41, 8.507059e+37 }
 0x66a   : > { %v1986_v52 = vpop.eup %1985  ;;  %v1455_v15 = vmul.f32 %v1984_v29, %v1454_v8 }
 0x66b   : > { %v1432_v21 = vsel %vm1431_vm13, %v1982_v62, %v1428_v9  ;;  %v1439_v27 = vmul.f32 %v1986_v52, %v1417_v26  ;;  %vm1444_vm6 = vweird.f32 %v1986_v52 }
 0x66c   : > { %v1437_v47 = vsel %vm1434_vm15, %v1436_v12, %v1432_v21  ;;  %v1456_v2 = vadd.f32 %v1984_v29, %v1455_v15  ;;  %vm1445_vm1 = vmor %vm1443_vm8, %vm1444_vm6 }
 0x66d   : > { %v1988_v13 = vpop.eup %1987  ;;  %v1440_v3 = vsub.f32 1.0, %v1439_v27  ;;  %v1480_v31 = vmul.f32 %v2765_v55, %v1437_v47 }
 0x66e   : > { %v1460_v32 = vsel %vm1459_vm3, %v1984_v29, %v1456_v2  ;;  %v1467_v33 = vmul.f32 %v1988_v13, %v1423_v6  ;;  %vm1472_vm9 = vweird.f32 %v1988_v13 }
 0x66f   : > { %v1465_v34 = vsel %vm1462_vm5, %v1464_v30, %v1460_v32  ;;  %v1441_v35 = vmul.f32 %v1986_v52, %v1440_v3  ;;  %1817 = vmatmul.msk.f32.vlgmr.msra.gmra.mxu3 %vm497_vm4, %v1480_v31  ;;  %vm1473_vm2 = vmor %vm1471_vm11, %vm1472_vm9 }
 0x670   : > { %v1468_v36 = vsub.f32 1.0, %v1467_v33  ;;  %v1482_v40 = vmul.f32 %v2770_v59, %v1465_v34 }
 0x671   : > { %v1442_v24 = vadd.f32 %v1986_v52, %v1441_v35 }
 0x672   : > { %v1469_v20 = vmul.f32 %v1988_v13, %v1468_v36  ;;  %1819 = vmatmul.msk.f32.vlgmr.msrb.gmra.mxu0 %vm497_vm4, %v1482_v40 }
 0x673   : > { %v1446_v55 = vsel %vm1445_vm1, %v1986_v52, %v1442_v24 }
 0x674   : > { %v1470_v38 = vadd.f32 %v1988_v13, %v1469_v20  ;;  %v1451_v61 = vsel %vm1448_vm10, %v1450_v16, %v1446_v55 }
 0x675   : > { %v1481_v44 = vmul.f32 %v2774_v46, %v1451_v61 }
 0x676   : > { %v1474_v59 = vsel %vm1473_vm2, %v1988_v13, %v1470_v38 }
 0x677   : > { %1818 = vmatmul.msk.f32.gmra.mxu3 %vm497_vm4, %v1481_v44  ;;  %v1479_v48 = vsel %vm1476_vm12, %v1478_v57, %v1474_v59 }
 0x678   : > { %v1483_v11 = vmul.f32 %v2778_v49, %v1479_v48 }
 0x67a   : > { %1820 = vmatmul.msk.f32.gmra.mxu0 %vm497_vm4, %v1483_v11 }
 0x6ef   : > { %v1588_v63 = vpop.f32.mrf.mxu0 }
 0x6f0   : > { %v1596_v50 = vadd.f32 %v1588_v63, %v2784_v58 }
 0x6f2   : > { %v1604_v54 = vadd.f32 %v1924_v53, %v1596_v50  ;;  %v1559_v25 = vpop.f32.mrf.mxu3 }
 0x6f3   : > { %v1594_v46 = vadd.f32 %v1559_v25, %v2722_v42 }
 0x6f4   : > { %1608 = vst.msk [vmem:[%s293_s11 + $0x10] sm:$0xff] %vm318_vm0, %v1604_v54 }
 0x6f5   : > { %v1602_v49 = vadd.f32 %v1924_v53, %v1594_v46 }
 0x6f7   : > { %1606 = vst.msk [vmem:[%s293_s11] sm:$0xff] %vm318_vm0, %v1602_v49  ;;  %v1591_v10 = vpop.f32.mrf.mxu0 }
 0x6f8   : > { %v1597_v58 = vadd.f32 %v1591_v10, %v2788_v60 }
 0x6fa   : > { %v1605_v0 = vadd.f32 %v1924_v53, %v1597_v58  ;;  %v1562_v42 = vpop.f32.mrf.mxu3 }
 0x6fb   : > { %v1595_v4 = vadd.f32 %v1562_v42, %v2725_v23 }
 0x6fc   : > { %1609 = vst.msk [vmem:[%s293_s11 + $0x18] sm:$0xff] %vm318_vm0, %v1605_v0 }
 0x6fd   : > { %v1603_v43 = vadd.f32 %v1924_v53, %v1595_v4 }
 0x6ff   : > { %1607 = vst.msk [vmem:[%s293_s11 + $0x8] sm:$0xff] %vm318_vm0, %v1603_v43 }
 0x700   : > { %2136 = shalt.err (!%p2133_p10)
}
 0x701   : > { %s2203_s17 = smov 128  }
 0x702   : > { %1845 = dma.vmem_to_hbm [thread:$0]  (%p2319_p3), %s1625_s23, 512, %s1627_s26, %s1611_s22, %s2203_s17, %s2203_s17, %s2199_s13  }
 0x703 PF: > { %s1641_s11 = sand.u32 1, %s2171_s18   ;;  %p2863_p12 = scmp.ge.s32.totalorder %s2183_s21, 2 }
 0x704   : > { %s1642_s24 = scalar_lea.sflag [#allocation4], %s1641_s11 }
 0x705   : > { %p1862_p13 = pnand %p2863_p12, %p2269_p6 }
 0x707   : > { %p1863_p0 = pneg %p1862_p13 }
 0x709   : > { %2166 = dma.done.wait (%p1863_p0), %s1642_s24, 512  }
 0x70a   : > { %2168 = vsyncadd (%p1863_p0), %s1642_s24, 4294966784  ;;  %p20_p5 = scmp.ge.s32.totalorder %s2306_s30, 4   ;;  %s2864_s18 = smov %s2175_s19 }
 0x70b   : > { %s2865_s19 = smov %s2179_s20  ;;  %s2866_s20 = smov %s2315_s9 }
 0x70c   : > { %s2867_s21 = smov %s2306_s30  ;;  %22 = sbr.rel (!%p20_p5) target bundleno = 7 (0x7), region = 97 }
 0x711   :  { %1648 = vsyncpa [#allocation3], 1 }
 0x712   :  { %1650 = vsyncpa [#allocation3 + $0x1], 1 }
 0x713   :  { %1651 = vsyncpa [#allocation6], 1 }
 0x714   :  { %1652 = vsyncpa [#allocation9], 1 }
 0x715   :  { %1653 = vsyncpa [#allocation4], 1 }
 0x716   :  { %1655 = vsyncpa [#allocation4 + $0x1], 1 }

</bundles_post_ra>
